<compile_context>
chip_gen: v7x
topology: tpu7x:2x2x1
jax: 0.10.0
libtpu: 0.0.40
codegen_flags: <defaults>
</compile_context>

<pallas_src>
import jax
import jax.numpy as jnp
from jax.experimental import pallas as pl
from jax.experimental.pallas import tpu as pltpu


BT = 8  # batch tile = sublane width


# ----------------------------------------------------------------------------
# Fused decoder kernel: all GRU layers + fc head in one kernel invocation.
# Refs: x(T,BT,D0) | per layer: wi(D,3H) wh(H,3H) bi_fold(1,3H) bhn(1,H)
#       | fc_w(H,Wp) fc_b(1,Wp) | out(T,BT,Wp) | scratch: gi, h_all, xin
# ----------------------------------------------------------------------------
def _make_fused_kernel(n_layers, T, H):
    def kernel(*refs):
        x_ref = refs[0]
        layer_refs = refs[1:1 + 4 * n_layers]
        fcw_ref = refs[1 + 4 * n_layers]
        fcb_ref = refs[2 + 4 * n_layers]
        out_ref = refs[3 + 4 * n_layers]
        gi_scr = refs[4 + 4 * n_layers]      # VMEM (T*BT, 3H) f32
        h_all = refs[5 + 4 * n_layers]       # VMEM (T*BT, H)  f32
        xin = refs[6 + 4 * n_layers]         # VMEM (T*BT, D0) f32

        # Stage layer-0 input time-major & flattened (whole-vreg copies, BT=8).
        for t in range(T):
            xin[t * BT:(t + 1) * BT, :] = x_ref[t].astype(jnp.float32)

        cur_in = xin[...]                                        # (T*BT, D0)

        for l in range(n_layers):
            wi = layer_refs[4 * l][...]                          # bf16 (D_l, 3H)
            wh = layer_refs[4 * l + 1][...]                      # bf16 (H, 3H)
            bi = layer_refs[4 * l + 2][...]                      # f32 (1, 3H)  (b_i + [b_hr|b_hz|0])
            bhn = layer_refs[4 * l + 3][...]                     # f32 (1, H)   (b_hn)

            # Hoisted input projection for ALL timesteps: one big bf16 MXU
            # matmul with f32 accumulation; r/z hidden biases folded in here
            # so they are off the serial recurrence path.
            gi_scr[...] = jnp.dot(cur_in.astype(jnp.bfloat16), wi,
                                  preferred_element_type=jnp.float32) + bi

            h = jnp.zeros((BT, H), jnp.float32)
            for t in range(T):                                   # static unroll (T small)
                gi = gi_scr[t * BT:(t + 1) * BT, :]              # (BT, 3H) 8-row aligned
                gh = jnp.dot(h.astype(jnp.bfloat16), wh,
                             preferred_element_type=jnp.float32) # (BT, 3H)
                r = jax.nn.sigmoid(gi[:, 0:H] + gh[:, 0:H])
                z = jax.nn.sigmoid(gi[:, H:2 * H] + gh[:, H:2 * H])
                n = jnp.tanh(gi[:, 2 * H:3 * H] + r * (gh[:, 2 * H:3 * H] + bhn))
                h = (1.0 - z) * n + z * h
                h_all[t * BT:(t + 1) * BT, :] = h                # aligned store

            cur_in = h_all[...]                                  # (T*BT, H) for next layer
            # TODO(synk): nn.GRU inter-layer dropout is training-only; inference semantics used.

        # fc head fused into the same kernel (lane-dense, Wp is a 128 multiple).
        out = jnp.dot(cur_in.astype(jnp.bfloat16), fcw_ref[...],
                      preferred_element_type=jnp.float32) + fcb_ref[...]
        for t in range(T):
            out_ref[t] = out[t * BT:(t + 1) * BT, :].astype(out_ref.dtype)

    return kernel


# ----------------------------------------------------------------------------
# pallas_call wrapper: batch-tiled grid, weights resident via constant index maps.
# ----------------------------------------------------------------------------
def fused_decoder_fc(x_tm, layers, fc_w, fc_b, T, Bp, H, Wp, D0):
    n_layers = len(layers)
    grid = (Bp // BT,)

    def const_spec(shape):
        nd = len(shape)
        return pl.BlockSpec(shape, lambda i, nd=nd: (0,) * nd)

    args = [x_tm]
    in_specs = [pl.BlockSpec((T, BT, D0), lambda i: (0, i, 0))]
    for lp in layers:
        for name in ("wi", "wh", "bi_fold", "bhn"):
            args.append(lp[name])
            in_specs.append(const_spec(lp[name].shape))
    args += [fc_w, fc_b]
    in_specs += [const_spec(fc_w.shape), const_spec(fc_b.shape)]

    out_spec = pl.BlockSpec((T, BT, Wp), lambda i: (0, i, 0))

    # VMEM budget from actual buffer sizes (weights + double-buffered x/out
    # blocks + scratch), with 2x headroom.  NOTE: v7x has only 64 MiB/TC; if
    # T*BT*3H grows past that, tile the T axis as well.
    weight_bytes = sum(int(a.size) * a.dtype.itemsize for a in args[1:])
    block_bytes = 2 * (T * BT * D0 * 4 + T * BT * Wp * 4)
    scratch_bytes = 4 * (T * BT * (3 * H) + T * BT * H + T * BT * D0)
    needed = weight_bytes + block_bytes + scratch_bytes
    vmem_limit = int(min(128 * 1024 * 1024, max(16 * 1024 * 1024, 2 * needed)))

    kernel = _make_fused_kernel(n_layers, T, H)

    return pl.pallas_call(
        kernel,
        out_shape=jax.ShapeDtypeStruct((T, Bp, Wp), jnp.float32),
        grid_spec=pltpu.PrefetchScalarGridSpec(
            num_scalar_prefetch=0,
            grid=grid,
            in_specs=in_specs,
            out_specs=out_spec,
            scratch_shapes=[
                pltpu.VMEM((T * BT, 3 * H), jnp.float32),   # hoisted input-gate projections
                pltpu.VMEM((T * BT, H), jnp.float32),       # per-layer hidden states
                pltpu.VMEM((T * BT, D0), jnp.float32),      # staged layer-0 input
            ],
        ),
        compiler_params=pltpu.CompilerParams(
            dimension_semantics=("parallel",),              # batch tiles independent (v7x 2 TCs)
            vmem_limit_bytes=vmem_limit,
        ),
    )(*args)


# ----------------------------------------------------------------------------
# Full model forward (tiny layout glue in JAX, everything hot in one kernel).
# ----------------------------------------------------------------------------
def _prep_params(params, Wp):
    """Fold r/z hidden biases into the input bias, cast matmul weights to bf16,
    zero-pad the fc head to Wp lanes."""
    layers = []
    for p in params["gru_layers"]:
        H = p["wh"].shape[0]
        bh_rz = jnp.concatenate(
            [p["bh"][:, :2 * H], jnp.zeros((1, H), p["bh"].dtype)], axis=1)
        layers.append({
            "wi": p["wi"].astype(jnp.bfloat16),
            "wh": p["wh"].astype(jnp.bfloat16),
            "bi_fold": (p["bi"] + bh_rz).astype(jnp.float32),
            "bhn": p["bh"][:, 2 * H:].astype(jnp.float32),
        })
    W = params["fc_w"].shape[1]
    fc_w = jnp.pad(params["fc_w"], ((0, 0), (0, Wp - W))).astype(jnp.bfloat16)
    fc_b = jnp.pad(params["fc_b"], ((0, 0), (0, Wp - W))).astype(jnp.float32)
    return layers, fc_w, fc_b


def reconstruction_model_forward(x, params, n_features):
    B, in_dim = x.shape
    T = n_features
    H = params["gru_layers"][0]["wh"].shape[0]
    W = params["fc_w"].shape[1]
    Bp = ((B + BT - 1) // BT) * BT
    Wp = ((W + 127) // 128) * 128

    # h_end.repeat_interleave(n_features, dim=1).view(B, n_features, -1)
    x_rep = jnp.repeat(x, T, axis=1).reshape(B, T, in_dim)
    # TODO(synk): this tiny repeat+transpose on the raw latent stays in XLA;
    # at scale it could be folded into the kernel via a staged gather.
    x_tm = jnp.transpose(x_rep, (1, 0, 2)).astype(jnp.float32)          # (T, B, D)
    x_tm = jnp.pad(x_tm, ((0, 0), (0, Bp - B), (0, 0)))                 # sublane-pad batch

    layers, fc_w, fc_b = _prep_params(params, Wp)
    out_tm = fused_decoder_fc(x_tm, layers, fc_w, fc_b, T, Bp, H, Wp, in_dim)  # (T, Bp, Wp)

    return jnp.transpose(out_tm, (1, 0, 2))[:B, :, :W]                  # (B, n_features, window)


# ----------------------------------------------------------------------------
# Deterministic parameter init (PyTorch-style uniform(-1/sqrt(H), 1/sqrt(H))),
# with gates fused as [r | z | n] column blocks.
# ----------------------------------------------------------------------------
def init_params(key, n_features, window_size, in_dim, hid_dim, n_layers):
    k = 1.0 / float(hid_dim) ** 0.5

    def u(kk, shape):
        return jax.random.uniform(kk, shape, jnp.float32, -k, k)

    gru_layers = []
    for layer in range(n_layers):
        d_in = in_dim if layer == 0 else hid_dim
        key, k_wi, k_wh, k_bi, k_bh = jax.random.split(key, 5)
        gru_layers.append({
            "wi": u(k_wi, (d_in, 3 * hid_dim)),     # [W_ir | W_iz | W_in]
            "wh": u(k_wh, (hid_dim, 3 * hid_dim)),  # [W_hr | W_hz | W_hn]
            "bi": u(k_bi, (1, 3 * hid_dim)),
            "bh": u(k_bh, (1, 3 * hid_dim)),
        })

    key, kw, kb = jax.random.split(key, 3)
    return {
        "gru_layers": gru_layers,
        "fc_w": u(kw, (hid_dim, window_size)),
        "fc_b": u(kb, (1, window_size)),
    }


# ----------------------------------------------------------------------------
# Pure-JAX f32 reference (correctness check; kernel uses bf16 MXU operands,
# hence the relaxed tolerance).
# ----------------------------------------------------------------------------
def _reference_forward(x, params, n_features):
    B = x.shape[0]
    h_all = jnp.repeat(x, n_features, axis=1).reshape(B, n_features, -1).astype(jnp.float32)
    for p in params["gru_layers"]:
        H = p["wh"].shape[0]

        def step(h, x_t, p=p, H=H):
            gi = x_t @ p["wi"] + p["bi"]
            gh = h @ p["wh"] + p["bh"]
            r = jax.nn.sigmoid(gi[:, 0:H] + gh[:, 0:H])
            z = jax.nn.sigmoid(gi[:, H:2 * H] + gh[:, H:2 * H])
            n = jnp.tanh(gi[:, 2 * H:3 * H] + r * gh[:, 2 * H:3 * H])
            h_new = (1.0 - z) * n + z * h
            return h_new, h_new

        h0 = jnp.zeros((B, H), jnp.float32)
        _, outs = jax.lax.scan(step, h0, jnp.transpose(h_all, (1, 0, 2)))
        h_all = jnp.transpose(outs, (1, 0, 2))
    return h_all @ params["fc_w"] + params["fc_b"]


if __name__ == "__main__":
    # Module hyper-parameters (small, consistent with the forward pass).
    n_features, window_size = 4, 8
    in_dim, hid_dim, out_dim = 8, 16, 8   # out_dim unused by forward (as in PyTorch)
    n_layers, dropout = 2, 0.2
    B = 2

    key = jax.random.PRNGKey(0)
    kx, kp = jax.random.split(key)
    x = jax.random.normal(kx, (B, in_dim), jnp.float32)
    params = init_params(kp, n_features, window_size, in_dim, hid_dim, n_layers)

    out = reconstruction_model_forward(x, params, n_features)
    out = jax.block_until_ready(out)

    assert out.shape == (B, n_features, window_size), out.shape

    ref = _reference_forward(x, params, n_features)
    # bf16 MXU operands -> relaxed tolerance vs the f32 reference.
    assert jnp.allclose(out, ref, atol=5e-2, rtol=5e-2), \
        f"max abs err {jnp.max(jnp.abs(out - ref))}"

    print("KERNEL_OK")
</pallas_src>

<mosaic_0001>
module attributes {stable_mosaic.version = 11 : i64} {
  func.func @kernel(%arg0: i32, %arg1: memref<4x8x8xf32, #tpu.memory_space<vmem>>, %arg2: memref<8x48xbf16, #tpu.memory_space<vmem>>, %arg3: memref<16x48xbf16, #tpu.memory_space<vmem>>, %arg4: memref<1x48xf32, #tpu.memory_space<vmem>>, %arg5: memref<1x16xf32, #tpu.memory_space<vmem>>, %arg6: memref<16x48xbf16, #tpu.memory_space<vmem>>, %arg7: memref<16x48xbf16, #tpu.memory_space<vmem>>, %arg8: memref<1x48xf32, #tpu.memory_space<vmem>>, %arg9: memref<1x16xf32, #tpu.memory_space<vmem>>, %arg10: memref<16x128xbf16, #tpu.memory_space<vmem>>, %arg11: memref<1x128xf32, #tpu.memory_space<vmem>>, %arg12: memref<4x8x128xf32, #tpu.memory_space<vmem>>, %arg13: memref<32x48xf32, #tpu.memory_space<vmem>>, %arg14: memref<32x16xf32, #tpu.memory_space<vmem>>, %arg15: memref<32x8xf32, #tpu.memory_space<vmem>>) attributes {dimension_semantics = [#tpu.dimension_semantics<parallel>], iteration_bounds = array<i64: 1>, scalar_prefetch = 0 : i64, scratch_operands = 3 : i64, tpu.core_type = #tpu.core_type<tc>, window_params = [{transform_indices = @transform_0, window_bounds = array<i64: 4, 8, 8>}, {pipeline_mode = #tpu.pipeline_mode<synchronous>, transform_indices = @transform_1, window_bounds = array<i64: 8, 48>}, {pipeline_mode = #tpu.pipeline_mode<synchronous>, transform_indices = @transform_2, window_bounds = array<i64: 16, 48>}, {pipeline_mode = #tpu.pipeline_mode<synchronous>, transform_indices = @transform_3, window_bounds = array<i64: 1, 48>}, {pipeline_mode = #tpu.pipeline_mode<synchronous>, transform_indices = @transform_4, window_bounds = array<i64: 1, 16>}, {pipeline_mode = #tpu.pipeline_mode<synchronous>, transform_indices = @transform_5, window_bounds = array<i64: 16, 48>}, {pipeline_mode = #tpu.pipeline_mode<synchronous>, transform_indices = @transform_6, window_bounds = array<i64: 16, 48>}, {pipeline_mode = #tpu.pipeline_mode<synchronous>, transform_indices = @transform_7, window_bounds = array<i64: 1, 48>}, {pipeline_mode = #tpu.pipeline_mode<synchronous>, transform_indices = @transform_8, window_bounds = array<i64: 1, 16>}, {pipeline_mode = #tpu.pipeline_mode<synchronous>, transform_indices = @transform_9, window_bounds = array<i64: 16, 128>}, {pipeline_mode = #tpu.pipeline_mode<synchronous>, transform_indices = @transform_10, window_bounds = array<i64: 1, 128>}, {transform_indices = @transform_11, window_bounds = array<i64: 4, 8, 128>}]} {
    %c0 = arith.constant 0 : index
    %c0_0 = arith.constant 0 : index
    %c0_1 = arith.constant 0 : index
    %0 = vector.load %arg1[%c0, %c0_0, %c0_1] : memref<4x8x8xf32, #tpu.memory_space<vmem>>, vector<1x8x8xf32>
    %1 = vector.shape_cast %0 : vector<1x8x8xf32> to vector<8x8xf32>
    %c0_2 = arith.constant 0 : index
    %c0_3 = arith.constant 0 : index
    %2 = vector.load %arg15[%c0_2, %c0_3] : memref<32x8xf32, #tpu.memory_space<vmem>>, vector<8x8xf32>
    tpu.vector_store %arg15[%c0_2, %c0_3], %1 {strides = array<i32>} : memref<32x8xf32, #tpu.memory_space<vmem>>, vector<8x8xf32>,
    %c1 = arith.constant 1 : index
    %c0_4 = arith.constant 0 : index
    %c0_5 = arith.constant 0 : index
    %3 = vector.load %arg1[%c1, %c0_4, %c0_5] : memref<4x8x8xf32, #tpu.memory_space<vmem>>, vector<1x8x8xf32>
    %4 = vector.shape_cast %3 : vector<1x8x8xf32> to vector<8x8xf32>
    %c8 = arith.constant 8 : index
    %c0_6 = arith.constant 0 : index
    %5 = vector.load %arg15[%c8, %c0_6] : memref<32x8xf32, #tpu.memory_space<vmem>>, vector<8x8xf32>
    tpu.vector_store %arg15[%c8, %c0_6], %4 {strides = array<i32>} : memref<32x8xf32, #tpu.memory_space<vmem>>, vector<8x8xf32>,
    %c2 = arith.constant 2 : index
    %c0_7 = arith.constant 0 : index
    %c0_8 = arith.constant 0 : index
    %6 = vector.load %arg1[%c2, %c0_7, %c0_8] : memref<4x8x8xf32, #tpu.memory_space<vmem>>, vector<1x8x8xf32>
    %7 = vector.shape_cast %6 : vector<1x8x8xf32> to vector<8x8xf32>
    %c16 = arith.constant 16 : index
    %c0_9 = arith.constant 0 : index
    %8 = vector.load %arg15[%c16, %c0_9] : memref<32x8xf32, #tpu.memory_space<vmem>>, vector<8x8xf32>
    tpu.vector_store %arg15[%c16, %c0_9], %7 {strides = array<i32>} : memref<32x8xf32, #tpu.memory_space<vmem>>, vector<8x8xf32>,
    %c3 = arith.constant 3 : index
    %c0_10 = arith.constant 0 : index
    %c0_11 = arith.constant 0 : index
    %9 = vector.load %arg1[%c3, %c0_10, %c0_11] : memref<4x8x8xf32, #tpu.memory_space<vmem>>, vector<1x8x8xf32>
    %10 = vector.shape_cast %9 : vector<1x8x8xf32> to vector<8x8xf32>
    %c24 = arith.constant 24 : index
    %c0_12 = arith.constant 0 : index
    %11 = vector.load %arg15[%c24, %c0_12] : memref<32x8xf32, #tpu.memory_space<vmem>>, vector<8x8xf32>
    tpu.vector_store %arg15[%c24, %c0_12], %10 {strides = array<i32>} : memref<32x8xf32, #tpu.memory_space<vmem>>, vector<8x8xf32>,
    %c0_13 = arith.constant 0 : index
    %c0_14 = arith.constant 0 : index
    %12 = vector.load %arg15[%c0_13, %c0_14] : memref<32x8xf32, #tpu.memory_space<vmem>>, vector<32x8xf32>
    %c0_15 = arith.constant 0 : index
    %c0_16 = arith.constant 0 : index
    %13 = vector.load %arg2[%c0_15, %c0_16] : memref<8x48xbf16, #tpu.memory_space<vmem>>, vector<8x48xbf16>
    %c0_17 = arith.constant 0 : index
    %c0_18 = arith.constant 0 : index
    %14 = vector.load %arg3[%c0_17, %c0_18] : memref<16x48xbf16, #tpu.memory_space<vmem>>, vector<16x48xbf16>
    %c0_19 = arith.constant 0 : index
    %c0_20 = arith.constant 0 : index
    %15 = vector.load %arg4[%c0_19, %c0_20] : memref<1x48xf32, #tpu.memory_space<vmem>>, vector<1x48xf32>
    %c0_21 = arith.constant 0 : index
    %c0_22 = arith.constant 0 : index
    %16 = vector.load %arg5[%c0_21, %c0_22] : memref<1x16xf32, #tpu.memory_space<vmem>>, vector<1x16xf32>
    %17 = arith.truncf %12 : vector<32x8xf32> to vector<32x8xbf16>
    %cst = arith.constant dense<0.000000e+00> : vector<32x48xf32>
    %18 = tpu.matmul %17, %13, %cst {dimension_numbers = #tpu.dot_dimension_numbers<[1], [0], [0], [1], [0, 0, 1, 1], [], []>} : vector<32x8xbf16>, vector<8x48xbf16>, vector<32x48xf32> -> vector<32x48xf32>
    %19 = vector.broadcast %15 : vector<1x48xf32> to vector<32x48xf32>
    %20 = arith.addf %18, %19 : vector<32x48xf32>
    %c0_23 = arith.constant 0 : index
    %c0_24 = arith.constant 0 : index
    %21 = vector.load %arg13[%c0_23, %c0_24] : memref<32x48xf32, #tpu.memory_space<vmem>>, vector<32x48xf32>
    tpu.vector_store %arg13[%c0_23, %c0_24], %20 {strides = array<i32>} : memref<32x48xf32, #tpu.memory_space<vmem>>, vector<32x48xf32>,
    %cst_25 = arith.constant 0.000000e+00 : f32
    %22 = vector.broadcast %cst_25 : f32 to vector<8x16xf32>
    %c0_26 = arith.constant 0 : index
    %c0_27 = arith.constant 0 : index
    %23 = vector.load %arg13[%c0_26, %c0_27] : memref<32x48xf32, #tpu.memory_space<vmem>>, vector<8x48xf32>
    %24 = arith.truncf %22 : vector<8x16xf32> to vector<8x16xbf16>
    %cst_28 = arith.constant dense<0.000000e+00> : vector<8x48xf32>
    %25 = tpu.matmul %24, %14, %cst_28 {dimension_numbers = #tpu.dot_dimension_numbers<[1], [0], [0], [1], [0, 0, 1, 1], [], []>} : vector<8x16xbf16>, vector<16x48xbf16>, vector<8x48xf32> -> vector<8x48xf32>
    %26 = vector.extract_strided_slice %23 {offsets = [0, 0], sizes = [8, 16], strides = [1, 1]} : vector<8x48xf32> to vector<8x16xf32>
    %27 = vector.extract_strided_slice %25 {offsets = [0, 0], sizes = [8, 16], strides = [1, 1]} : vector<8x48xf32> to vector<8x16xf32>
    %28 = arith.addf %26, %27 : vector<8x16xf32>
    %29 = arith.negf %28 : vector<8x16xf32>
    %30 = math.exp %29 : vector<8x16xf32>
    %cst_29 = arith.constant 1.000000e+00 : f32
    %31 = vector.broadcast %cst_29 : f32 to vector<8x16xf32>
    %32 = arith.addf %31, %30 : vector<8x16xf32>
    %33 = arith.divf %31, %32 : vector<8x16xf32>
    %34 = vector.extract_strided_slice %23 {offsets = [0, 16], sizes = [8, 16], strides = [1, 1]} : vector<8x48xf32> to vector<8x16xf32>
    %35 = vector.extract_strided_slice %25 {offsets = [0, 16], sizes = [8, 16], strides = [1, 1]} : vector<8x48xf32> to vector<8x16xf32>
    %36 = arith.addf %34, %35 : vector<8x16xf32>
    %37 = arith.negf %36 : vector<8x16xf32>
    %38 = math.exp %37 : vector<8x16xf32>
    %cst_30 = arith.constant 1.000000e+00 : f32
    %39 = vector.broadcast %cst_30 : f32 to vector<8x16xf32>
    %40 = arith.addf %39, %38 : vector<8x16xf32>
    %41 = arith.divf %39, %40 : vector<8x16xf32>
    %42 = vector.extract_strided_slice %23 {offsets = [0, 32], sizes = [8, 16], strides = [1, 1]} : vector<8x48xf32> to vector<8x16xf32>
    %43 = vector.extract_strided_slice %25 {offsets = [0, 32], sizes = [8, 16], strides = [1, 1]} : vector<8x48xf32> to vector<8x16xf32>
    %44 = vector.broadcast %16 : vector<1x16xf32> to vector<8x16xf32>
    %45 = arith.addf %43, %44 : vector<8x16xf32>
    %46 = arith.mulf %33, %45 : vector<8x16xf32>
    %47 = arith.addf %42, %46 : vector<8x16xf32>
    %48 = math.tanh %47 : vector<8x16xf32>
    %cst_31 = arith.constant 1.000000e+00 : f32
    %49 = vector.broadcast %cst_31 : f32 to vector<8x16xf32>
    %50 = arith.subf %49, %41 : vector<8x16xf32>
    %51 = arith.mulf %50, %48 : vector<8x16xf32>
    %52 = arith.mulf %41, %22 : vector<8x16xf32>
    %53 = arith.addf %51, %52 : vector<8x16xf32>
    %c0_32 = arith.constant 0 : index
    %c0_33 = arith.constant 0 : index
    %54 = vector.load %arg14[%c0_32, %c0_33] : memref<32x16xf32, #tpu.memory_space<vmem>>, vector<8x16xf32>
    tpu.vector_store %arg14[%c0_32, %c0_33], %53 {strides = array<i32>} : memref<32x16xf32, #tpu.memory_space<vmem>>, vector<8x16xf32>,
    %c8_34 = arith.constant 8 : index
    %c0_35 = arith.constant 0 : index
    %55 = vector.load %arg13[%c8_34, %c0_35] : memref<32x48xf32, #tpu.memory_space<vmem>>, vector<8x48xf32>
    %56 = arith.truncf %53 : vector<8x16xf32> to vector<8x16xbf16>
    %cst_36 = arith.constant dense<0.000000e+00> : vector<8x48xf32>
    %57 = tpu.matmul %56, %14, %cst_36 {dimension_numbers = #tpu.dot_dimension_numbers<[1], [0], [0], [1], [0, 0, 1, 1], [], []>} : vector<8x16xbf16>, vector<16x48xbf16>, vector<8x48xf32> -> vector<8x48xf32>
    %58 = vector.extract_strided_slice %55 {offsets = [0, 0], sizes = [8, 16], strides = [1, 1]} : vector<8x48xf32> to vector<8x16xf32>
    %59 = vector.extract_strided_slice %57 {offsets = [0, 0], sizes = [8, 16], strides = [1, 1]} : vector<8x48xf32> to vector<8x16xf32>
    %60 = arith.addf %58, %59 : vector<8x16xf32>
    %61 = arith.negf %60 : vector<8x16xf32>
    %62 = math.exp %61 : vector<8x16xf32>
    %cst_37 = arith.constant 1.000000e+00 : f32
    %63 = vector.broadcast %cst_37 : f32 to vector<8x16xf32>
    %64 = arith.addf %63, %62 : vector<8x16xf32>
    %65 = arith.divf %63, %64 : vector<8x16xf32>
    %66 = vector.extract_strided_slice %55 {offsets = [0, 16], sizes = [8, 16], strides = [1, 1]} : vector<8x48xf32> to vector<8x16xf32>
    %67 = vector.extract_strided_slice %57 {offsets = [0, 16], sizes = [8, 16], strides = [1, 1]} : vector<8x48xf32> to vector<8x16xf32>
    %68 = arith.addf %66, %67 : vector<8x16xf32>
    %69 = arith.negf %68 : vector<8x16xf32>
    %70 = math.exp %69 : vector<8x16xf32>
    %cst_38 = arith.constant 1.000000e+00 : f32
    %71 = vector.broadcast %cst_38 : f32 to vector<8x16xf32>
    %72 = arith.addf %71, %70 : vector<8x16xf32>
    %73 = arith.divf %71, %72 : vector<8x16xf32>
    %74 = vector.extract_strided_slice %55 {offsets = [0, 32], sizes = [8, 16], strides = [1, 1]} : vector<8x48xf32> to vector<8x16xf32>
    %75 = vector.extract_strided_slice %57 {offsets = [0, 32], sizes = [8, 16], strides = [1, 1]} : vector<8x48xf32> to vector<8x16xf32>
    %76 = vector.broadcast %16 : vector<1x16xf32> to vector<8x16xf32>
    %77 = arith.addf %75, %76 : vector<8x16xf32>
    %78 = arith.mulf %65, %77 : vector<8x16xf32>
    %79 = arith.addf %74, %78 : vector<8x16xf32>
    %80 = math.tanh %79 : vector<8x16xf32>
    %cst_39 = arith.constant 1.000000e+00 : f32
    %81 = vector.broadcast %cst_39 : f32 to vector<8x16xf32>
    %82 = arith.subf %81, %73 : vector<8x16xf32>
    %83 = arith.mulf %82, %80 : vector<8x16xf32>
    %84 = arith.mulf %73, %53 : vector<8x16xf32>
    %85 = arith.addf %83, %84 : vector<8x16xf32>
    %c8_40 = arith.constant 8 : index
    %c0_41 = arith.constant 0 : index
    %86 = vector.load %arg14[%c8_40, %c0_41] : memref<32x16xf32, #tpu.memory_space<vmem>>, vector<8x16xf32>
    tpu.vector_store %arg14[%c8_40, %c0_41], %85 {strides = array<i32>} : memref<32x16xf32, #tpu.memory_space<vmem>>, vector<8x16xf32>,
    %c16_42 = arith.constant 16 : index
    %c0_43 = arith.constant 0 : index
    %87 = vector.load %arg13[%c16_42, %c0_43] : memref<32x48xf32, #tpu.memory_space<vmem>>, vector<8x48xf32>
    %88 = arith.truncf %85 : vector<8x16xf32> to vector<8x16xbf16>
    %cst_44 = arith.constant dense<0.000000e+00> : vector<8x48xf32>
    %89 = tpu.matmul %88, %14, %cst_44 {dimension_numbers = #tpu.dot_dimension_numbers<[1], [0], [0], [1], [0, 0, 1, 1], [], []>} : vector<8x16xbf16>, vector<16x48xbf16>, vector<8x48xf32> -> vector<8x48xf32>
    %90 = vector.extract_strided_slice %87 {offsets = [0, 0], sizes = [8, 16], strides = [1, 1]} : vector<8x48xf32> to vector<8x16xf32>
    %91 = vector.extract_strided_slice %89 {offsets = [0, 0], sizes = [8, 16], strides = [1, 1]} : vector<8x48xf32> to vector<8x16xf32>
    %92 = arith.addf %90, %91 : vector<8x16xf32>
    %93 = arith.negf %92 : vector<8x16xf32>
    %94 = math.exp %93 : vector<8x16xf32>
    %cst_45 = arith.constant 1.000000e+00 : f32
    %95 = vector.broadcast %cst_45 : f32 to vector<8x16xf32>
    %96 = arith.addf %95, %94 : vector<8x16xf32>
    %97 = arith.divf %95, %96 : vector<8x16xf32>
    %98 = vector.extract_strided_slice %87 {offsets = [0, 16], sizes = [8, 16], strides = [1, 1]} : vector<8x48xf32> to vector<8x16xf32>
    %99 = vector.extract_strided_slice %89 {offsets = [0, 16], sizes = [8, 16], strides = [1, 1]} : vector<8x48xf32> to vector<8x16xf32>
    %100 = arith.addf %98, %99 : vector<8x16xf32>
    %101 = arith.negf %100 : vector<8x16xf32>
    %102 = math.exp %101 : vector<8x16xf32>
    %cst_46 = arith.constant 1.000000e+00 : f32
    %103 = vector.broadcast %cst_46 : f32 to vector<8x16xf32>
    %104 = arith.addf %103, %102 : vector<8x16xf32>
    %105 = arith.divf %103, %104 : vector<8x16xf32>
    %106 = vector.extract_strided_slice %87 {offsets = [0, 32], sizes = [8, 16], strides = [1, 1]} : vector<8x48xf32> to vector<8x16xf32>
    %107 = vector.extract_strided_slice %89 {offsets = [0, 32], sizes = [8, 16], strides = [1, 1]} : vector<8x48xf32> to vector<8x16xf32>
    %108 = vector.broadcast %16 : vector<1x16xf32> to vector<8x16xf32>
    %109 = arith.addf %107, %108 : vector<8x16xf32>
    %110 = arith.mulf %97, %109 : vector<8x16xf32>
    %111 = arith.addf %106, %110 : vector<8x16xf32>
    %112 = math.tanh %111 : vector<8x16xf32>
    %cst_47 = arith.constant 1.000000e+00 : f32
    %113 = vector.broadcast %cst_47 : f32 to vector<8x16xf32>
    %114 = arith.subf %113, %105 : vector<8x16xf32>
    %115 = arith.mulf %114, %112 : vector<8x16xf32>
    %116 = arith.mulf %105, %85 : vector<8x16xf32>
    %117 = arith.addf %115, %116 : vector<8x16xf32>
    %c16_48 = arith.constant 16 : index
    %c0_49 = arith.constant 0 : index
    %118 = vector.load %arg14[%c16_48, %c0_49] : memref<32x16xf32, #tpu.memory_space<vmem>>, vector<8x16xf32>
    tpu.vector_store %arg14[%c16_48, %c0_49], %117 {strides = array<i32>} : memref<32x16xf32, #tpu.memory_space<vmem>>, vector<8x16xf32>,
    %c24_50 = arith.constant 24 : index
    %c0_51 = arith.constant 0 : index
    %119 = vector.load %arg13[%c24_50, %c0_51] : memref<32x48xf32, #tpu.memory_space<vmem>>, vector<8x48xf32>
    %120 = arith.truncf %117 : vector<8x16xf32> to vector<8x16xbf16>
    %cst_52 = arith.constant dense<0.000000e+00> : vector<8x48xf32>
    %121 = tpu.matmul %120, %14, %cst_52 {dimension_numbers = #tpu.dot_dimension_numbers<[1], [0], [0], [1], [0, 0, 1, 1], [], []>} : vector<8x16xbf16>, vector<16x48xbf16>, vector<8x48xf32> -> vector<8x48xf32>
    %122 = vector.extract_strided_slice %119 {offsets = [0, 0], sizes = [8, 16], strides = [1, 1]} : vector<8x48xf32> to vector<8x16xf32>
    %123 = vector.extract_strided_slice %121 {offsets = [0, 0], sizes = [8, 16], strides = [1, 1]} : vector<8x48xf32> to vector<8x16xf32>
    %124 = arith.addf %122, %123 : vector<8x16xf32>
    %125 = arith.negf %124 : vector<8x16xf32>
    %126 = math.exp %125 : vector<8x16xf32>
    %cst_53 = arith.constant 1.000000e+00 : f32
    %127 = vector.broadcast %cst_53 : f32 to vector<8x16xf32>
    %128 = arith.addf %127, %126 : vector<8x16xf32>
    %129 = arith.divf %127, %128 : vector<8x16xf32>
    %130 = vector.extract_strided_slice %119 {offsets = [0, 16], sizes = [8, 16], strides = [1, 1]} : vector<8x48xf32> to vector<8x16xf32>
    %131 = vector.extract_strided_slice %121 {offsets = [0, 16], sizes = [8, 16], strides = [1, 1]} : vector<8x48xf32> to vector<8x16xf32>
    %132 = arith.addf %130, %131 : vector<8x16xf32>
    %133 = arith.negf %132 : vector<8x16xf32>
    %134 = math.exp %133 : vector<8x16xf32>
    %cst_54 = arith.constant 1.000000e+00 : f32
    %135 = vector.broadcast %cst_54 : f32 to vector<8x16xf32>
    %136 = arith.addf %135, %134 : vector<8x16xf32>
    %137 = arith.divf %135, %136 : vector<8x16xf32>
    %138 = vector.extract_strided_slice %119 {offsets = [0, 32], sizes = [8, 16], strides = [1, 1]} : vector<8x48xf32> to vector<8x16xf32>
    %139 = vector.extract_strided_slice %121 {offsets = [0, 32], sizes = [8, 16], strides = [1, 1]} : vector<8x48xf32> to vector<8x16xf32>
    %140 = vector.broadcast %16 : vector<1x16xf32> to vector<8x16xf32>
    %141 = arith.addf %139, %140 : vector<8x16xf32>
    %142 = arith.mulf %129, %141 : vector<8x16xf32>
    %143 = arith.addf %138, %142 : vector<8x16xf32>
    %144 = math.tanh %143 : vector<8x16xf32>
    %cst_55 = arith.constant 1.000000e+00 : f32
    %145 = vector.broadcast %cst_55 : f32 to vector<8x16xf32>
    %146 = arith.subf %145, %137 : vector<8x16xf32>
    %147 = arith.mulf %146, %144 : vector<8x16xf32>
    %148 = arith.mulf %137, %117 : vector<8x16xf32>
    %149 = arith.addf %147, %148 : vector<8x16xf32>
    %c24_56 = arith.constant 24 : index
    %c0_57 = arith.constant 0 : index
    %150 = vector.load %arg14[%c24_56, %c0_57] : memref<32x16xf32, #tpu.memory_space<vmem>>, vector<8x16xf32>
    tpu.vector_store %arg14[%c24_56, %c0_57], %149 {strides = array<i32>} : memref<32x16xf32, #tpu.memory_space<vmem>>, vector<8x16xf32>,
    %c0_58 = arith.constant 0 : index
    %c0_59 = arith.constant 0 : index
    %151 = vector.load %arg14[%c0_58, %c0_59] : memref<32x16xf32, #tpu.memory_space<vmem>>, vector<32x16xf32>
    %c0_60 = arith.constant 0 : index
    %c0_61 = arith.constant 0 : index
    %152 = vector.load %arg6[%c0_60, %c0_61] : memref<16x48xbf16, #tpu.memory_space<vmem>>, vector<16x48xbf16>
    %c0_62 = arith.constant 0 : index
    %c0_63 = arith.constant 0 : index
    %153 = vector.load %arg7[%c0_62, %c0_63] : memref<16x48xbf16, #tpu.memory_space<vmem>>, vector<16x48xbf16>
    %c0_64 = arith.constant 0 : index
    %c0_65 = arith.constant 0 : index
    %154 = vector.load %arg8[%c0_64, %c0_65] : memref<1x48xf32, #tpu.memory_space<vmem>>, vector<1x48xf32>
    %c0_66 = arith.constant 0 : index
    %c0_67 = arith.constant 0 : index
    %155 = vector.load %arg9[%c0_66, %c0_67] : memref<1x16xf32, #tpu.memory_space<vmem>>, vector<1x16xf32>
    %156 = arith.truncf %151 : vector<32x16xf32> to vector<32x16xbf16>
    %cst_68 = arith.constant dense<0.000000e+00> : vector<32x48xf32>
    %157 = tpu.matmul %156, %152, %cst_68 {dimension_numbers = #tpu.dot_dimension_numbers<[1], [0], [0], [1], [0, 0, 1, 1], [], []>} : vector<32x16xbf16>, vector<16x48xbf16>, vector<32x48xf32> -> vector<32x48xf32>
    %158 = vector.broadcast %154 : vector<1x48xf32> to vector<32x48xf32>
    %159 = arith.addf %157, %158 : vector<32x48xf32>
    %c0_69 = arith.constant 0 : index
    %c0_70 = arith.constant 0 : index
    %160 = vector.load %arg13[%c0_69, %c0_70] : memref<32x48xf32, #tpu.memory_space<vmem>>, vector<32x48xf32>
    tpu.vector_store %arg13[%c0_69, %c0_70], %159 {strides = array<i32>} : memref<32x48xf32, #tpu.memory_space<vmem>>, vector<32x48xf32>,
    %cst_71 = arith.constant 0.000000e+00 : f32
    %161 = vector.broadcast %cst_71 : f32 to vector<8x16xf32>
    %c0_72 = arith.constant 0 : index
    %c0_73 = arith.constant 0 : index
    %162 = vector.load %arg13[%c0_72, %c0_73] : memref<32x48xf32, #tpu.memory_space<vmem>>, vector<8x48xf32>
    %163 = arith.truncf %161 : vector<8x16xf32> to vector<8x16xbf16>
    %cst_74 = arith.constant dense<0.000000e+00> : vector<8x48xf32>
    %164 = tpu.matmul %163, %153, %cst_74 {dimension_numbers = #tpu.dot_dimension_numbers<[1], [0], [0], [1], [0, 0, 1, 1], [], []>} : vector<8x16xbf16>, vector<16x48xbf16>, vector<8x48xf32> -> vector<8x48xf32>
    %165 = vector.extract_strided_slice %162 {offsets = [0, 0], sizes = [8, 16], strides = [1, 1]} : vector<8x48xf32> to vector<8x16xf32>
    %166 = vector.extract_strided_slice %164 {offsets = [0, 0], sizes = [8, 16], strides = [1, 1]} : vector<8x48xf32> to vector<8x16xf32>
    %167 = arith.addf %165, %166 : vector<8x16xf32>
    %168 = arith.negf %167 : vector<8x16xf32>
    %169 = math.exp %168 : vector<8x16xf32>
    %cst_75 = arith.constant 1.000000e+00 : f32
    %170 = vector.broadcast %cst_75 : f32 to vector<8x16xf32>
    %171 = arith.addf %170, %169 : vector<8x16xf32>
    %172 = arith.divf %170, %171 : vector<8x16xf32>
    %173 = vector.extract_strided_slice %162 {offsets = [0, 16], sizes = [8, 16], strides = [1, 1]} : vector<8x48xf32> to vector<8x16xf32>
    %174 = vector.extract_strided_slice %164 {offsets = [0, 16], sizes = [8, 16], strides = [1, 1]} : vector<8x48xf32> to vector<8x16xf32>
    %175 = arith.addf %173, %174 : vector<8x16xf32>
    %176 = arith.negf %175 : vector<8x16xf32>
    %177 = math.exp %176 : vector<8x16xf32>
    %cst_76 = arith.constant 1.000000e+00 : f32
    %178 = vector.broadcast %cst_76 : f32 to vector<8x16xf32>
    %179 = arith.addf %178, %177 : vector<8x16xf32>
    %180 = arith.divf %178, %179 : vector<8x16xf32>
    %181 = vector.extract_strided_slice %162 {offsets = [0, 32], sizes = [8, 16], strides = [1, 1]} : vector<8x48xf32> to vector<8x16xf32>
    %182 = vector.extract_strided_slice %164 {offsets = [0, 32], sizes = [8, 16], strides = [1, 1]} : vector<8x48xf32> to vector<8x16xf32>
    %183 = vector.broadcast %155 : vector<1x16xf32> to vector<8x16xf32>
    %184 = arith.addf %182, %183 : vector<8x16xf32>
    %185 = arith.mulf %172, %184 : vector<8x16xf32>
    %186 = arith.addf %181, %185 : vector<8x16xf32>
    %187 = math.tanh %186 : vector<8x16xf32>
    %cst_77 = arith.constant 1.000000e+00 : f32
    %188 = vector.broadcast %cst_77 : f32 to vector<8x16xf32>
    %189 = arith.subf %188, %180 : vector<8x16xf32>
    %190 = arith.mulf %189, %187 : vector<8x16xf32>
    %191 = arith.mulf %180, %161 : vector<8x16xf32>
    %192 = arith.addf %190, %191 : vector<8x16xf32>
    %c0_78 = arith.constant 0 : index
    %c0_79 = arith.constant 0 : index
    %193 = vector.load %arg14[%c0_78, %c0_79] : memref<32x16xf32, #tpu.memory_space<vmem>>, vector<8x16xf32>
    tpu.vector_store %arg14[%c0_78, %c0_79], %192 {strides = array<i32>} : memref<32x16xf32, #tpu.memory_space<vmem>>, vector<8x16xf32>,
    %c8_80 = arith.constant 8 : index
    %c0_81 = arith.constant 0 : index
    %194 = vector.load %arg13[%c8_80, %c0_81] : memref<32x48xf32, #tpu.memory_space<vmem>>, vector<8x48xf32>
    %195 = arith.truncf %192 : vector<8x16xf32> to vector<8x16xbf16>
    %cst_82 = arith.constant dense<0.000000e+00> : vector<8x48xf32>
    %196 = tpu.matmul %195, %153, %cst_82 {dimension_numbers = #tpu.dot_dimension_numbers<[1], [0], [0], [1], [0, 0, 1, 1], [], []>} : vector<8x16xbf16>, vector<16x48xbf16>, vector<8x48xf32> -> vector<8x48xf32>
    %197 = vector.extract_strided_slice %194 {offsets = [0, 0], sizes = [8, 16], strides = [1, 1]} : vector<8x48xf32> to vector<8x16xf32>
    %198 = vector.extract_strided_slice %196 {offsets = [0, 0], sizes = [8, 16], strides = [1, 1]} : vector<8x48xf32> to vector<8x16xf32>
    %199 = arith.addf %197, %198 : vector<8x16xf32>
    %200 = arith.negf %199 : vector<8x16xf32>
    %201 = math.exp %200 : vector<8x16xf32>
    %cst_83 = arith.constant 1.000000e+00 : f32
    %202 = vector.broadcast %cst_83 : f32 to vector<8x16xf32>
    %203 = arith.addf %202, %201 : vector<8x16xf32>
    %204 = arith.divf %202, %203 : vector<8x16xf32>
    %205 = vector.extract_strided_slice %194 {offsets = [0, 16], sizes = [8, 16], strides = [1, 1]} : vector<8x48xf32> to vector<8x16xf32>
    %206 = vector.extract_strided_slice %196 {offsets = [0, 16], sizes = [8, 16], strides = [1, 1]} : vector<8x48xf32> to vector<8x16xf32>
    %207 = arith.addf %205, %206 : vector<8x16xf32>
    %208 = arith.negf %207 : vector<8x16xf32>
    %209 = math.exp %208 : vector<8x16xf32>
    %cst_84 = arith.constant 1.000000e+00 : f32
    %210 = vector.broadcast %cst_84 : f32 to vector<8x16xf32>
    %211 = arith.addf %210, %209 : vector<8x16xf32>
    %212 = arith.divf %210, %211 : vector<8x16xf32>
    %213 = vector.extract_strided_slice %194 {offsets = [0, 32], sizes = [8, 16], strides = [1, 1]} : vector<8x48xf32> to vector<8x16xf32>
    %214 = vector.extract_strided_slice %196 {offsets = [0, 32], sizes = [8, 16], strides = [1, 1]} : vector<8x48xf32> to vector<8x16xf32>
    %215 = vector.broadcast %155 : vector<1x16xf32> to vector<8x16xf32>
    %216 = arith.addf %214, %215 : vector<8x16xf32>
    %217 = arith.mulf %204, %216 : vector<8x16xf32>
    %218 = arith.addf %213, %217 : vector<8x16xf32>
    %219 = math.tanh %218 : vector<8x16xf32>
    %cst_85 = arith.constant 1.000000e+00 : f32
    %220 = vector.broadcast %cst_85 : f32 to vector<8x16xf32>
    %221 = arith.subf %220, %212 : vector<8x16xf32>
    %222 = arith.mulf %221, %219 : vector<8x16xf32>
    %223 = arith.mulf %212, %192 : vector<8x16xf32>
    %224 = arith.addf %222, %223 : vector<8x16xf32>
    %c8_86 = arith.constant 8 : index
    %c0_87 = arith.constant 0 : index
    %225 = vector.load %arg14[%c8_86, %c0_87] : memref<32x16xf32, #tpu.memory_space<vmem>>, vector<8x16xf32>
    tpu.vector_store %arg14[%c8_86, %c0_87], %224 {strides = array<i32>} : memref<32x16xf32, #tpu.memory_space<vmem>>, vector<8x16xf32>,
    %c16_88 = arith.constant 16 : index
    %c0_89 = arith.constant 0 : index
    %226 = vector.load %arg13[%c16_88, %c0_89] : memref<32x48xf32, #tpu.memory_space<vmem>>, vector<8x48xf32>
    %227 = arith.truncf %224 : vector<8x16xf32> to vector<8x16xbf16>
    %cst_90 = arith.constant dense<0.000000e+00> : vector<8x48xf32>
    %228 = tpu.matmul %227, %153, %cst_90 {dimension_numbers = #tpu.dot_dimension_numbers<[1], [0], [0], [1], [0, 0, 1, 1], [], []>} : vector<8x16xbf16>, vector<16x48xbf16>, vector<8x48xf32> -> vector<8x48xf32>
    %229 = vector.extract_strided_slice %226 {offsets = [0, 0], sizes = [8, 16], strides = [1, 1]} : vector<8x48xf32> to vector<8x16xf32>
    %230 = vector.extract_strided_slice %228 {offsets = [0, 0], sizes = [8, 16], strides = [1, 1]} : vector<8x48xf32> to vector<8x16xf32>
    %231 = arith.addf %229, %230 : vector<8x16xf32>
    %232 = arith.negf %231 : vector<8x16xf32>
    %233 = math.exp %232 : vector<8x16xf32>
    %cst_91 = arith.constant 1.000000e+00 : f32
    %234 = vector.broadcast %cst_91 : f32 to vector<8x16xf32>
    %235 = arith.addf %234, %233 : vector<8x16xf32>
    %236 = arith.divf %234, %235 : vector<8x16xf32>
    %237 = vector.extract_strided_slice %226 {offsets = [0, 16], sizes = [8, 16], strides = [1, 1]} : vector<8x48xf32> to vector<8x16xf32>
    %238 = vector.extract_strided_slice %228 {offsets = [0, 16], sizes = [8, 16], strides = [1, 1]} : vector<8x48xf32> to vector<8x16xf32>
    %239 = arith.addf %237, %238 : vector<8x16xf32>
    %240 = arith.negf %239 : vector<8x16xf32>
    %241 = math.exp %240 : vector<8x16xf32>
    %cst_92 = arith.constant 1.000000e+00 : f32
    %242 = vector.broadcast %cst_92 : f32 to vector<8x16xf32>
    %243 = arith.addf %242, %241 : vector<8x16xf32>
    %244 = arith.divf %242, %243 : vector<8x16xf32>
    %245 = vector.extract_strided_slice %226 {offsets = [0, 32], sizes = [8, 16], strides = [1, 1]} : vector<8x48xf32> to vector<8x16xf32>
    %246 = vector.extract_strided_slice %228 {offsets = [0, 32], sizes = [8, 16], strides = [1, 1]} : vector<8x48xf32> to vector<8x16xf32>
    %247 = vector.broadcast %155 : vector<1x16xf32> to vector<8x16xf32>
    %248 = arith.addf %246, %247 : vector<8x16xf32>
    %249 = arith.mulf %236, %248 : vector<8x16xf32>
    %250 = arith.addf %245, %249 : vector<8x16xf32>
    %251 = math.tanh %250 : vector<8x16xf32>
    %cst_93 = arith.constant 1.000000e+00 : f32
    %252 = vector.broadcast %cst_93 : f32 to vector<8x16xf32>
    %253 = arith.subf %252, %244 : vector<8x16xf32>
    %254 = arith.mulf %253, %251 : vector<8x16xf32>
    %255 = arith.mulf %244, %224 : vector<8x16xf32>
    %256 = arith.addf %254, %255 : vector<8x16xf32>
    %c16_94 = arith.constant 16 : index
    %c0_95 = arith.constant 0 : index
    %257 = vector.load %arg14[%c16_94, %c0_95] : memref<32x16xf32, #tpu.memory_space<vmem>>, vector<8x16xf32>
    tpu.vector_store %arg14[%c16_94, %c0_95], %256 {strides = array<i32>} : memref<32x16xf32, #tpu.memory_space<vmem>>, vector<8x16xf32>,
    %c24_96 = arith.constant 24 : index
    %c0_97 = arith.constant 0 : index
    %258 = vector.load %arg13[%c24_96, %c0_97] : memref<32x48xf32, #tpu.memory_space<vmem>>, vector<8x48xf32>
    %259 = arith.truncf %256 : vector<8x16xf32> to vector<8x16xbf16>
    %cst_98 = arith.constant dense<0.000000e+00> : vector<8x48xf32>
    %260 = tpu.matmul %259, %153, %cst_98 {dimension_numbers = #tpu.dot_dimension_numbers<[1], [0], [0], [1], [0, 0, 1, 1], [], []>} : vector<8x16xbf16>, vector<16x48xbf16>, vector<8x48xf32> -> vector<8x48xf32>
    %261 = vector.extract_strided_slice %258 {offsets = [0, 0], sizes = [8, 16], strides = [1, 1]} : vector<8x48xf32> to vector<8x16xf32>
    %262 = vector.extract_strided_slice %260 {offsets = [0, 0], sizes = [8, 16], strides = [1, 1]} : vector<8x48xf32> to vector<8x16xf32>
    %263 = arith.addf %261, %262 : vector<8x16xf32>
    %264 = arith.negf %263 : vector<8x16xf32>
    %265 = math.exp %264 : vector<8x16xf32>
    %cst_99 = arith.constant 1.000000e+00 : f32
    %266 = vector.broadcast %cst_99 : f32 to vector<8x16xf32>
    %267 = arith.addf %266, %265 : vector<8x16xf32>
    %268 = arith.divf %266, %267 : vector<8x16xf32>
    %269 = vector.extract_strided_slice %258 {offsets = [0, 16], sizes = [8, 16], strides = [1, 1]} : vector<8x48xf32> to vector<8x16xf32>
    %270 = vector.extract_strided_slice %260 {offsets = [0, 16], sizes = [8, 16], strides = [1, 1]} : vector<8x48xf32> to vector<8x16xf32>
    %271 = arith.addf %269, %270 : vector<8x16xf32>
    %272 = arith.negf %271 : vector<8x16xf32>
    %273 = math.exp %272 : vector<8x16xf32>
    %cst_100 = arith.constant 1.000000e+00 : f32
    %274 = vector.broadcast %cst_100 : f32 to vector<8x16xf32>
    %275 = arith.addf %274, %273 : vector<8x16xf32>
    %276 = arith.divf %274, %275 : vector<8x16xf32>
    %277 = vector.extract_strided_slice %258 {offsets = [0, 32], sizes = [8, 16], strides = [1, 1]} : vector<8x48xf32> to vector<8x16xf32>
    %278 = vector.extract_strided_slice %260 {offsets = [0, 32], sizes = [8, 16], strides = [1, 1]} : vector<8x48xf32> to vector<8x16xf32>
    %279 = vector.broadcast %155 : vector<1x16xf32> to vector<8x16xf32>
    %280 = arith.addf %278, %279 : vector<8x16xf32>
    %281 = arith.mulf %268, %280 : vector<8x16xf32>
    %282 = arith.addf %277, %281 : vector<8x16xf32>
    %283 = math.tanh %282 : vector<8x16xf32>
    %cst_101 = arith.constant 1.000000e+00 : f32
    %284 = vector.broadcast %cst_101 : f32 to vector<8x16xf32>
    %285 = arith.subf %284, %276 : vector<8x16xf32>
    %286 = arith.mulf %285, %283 : vector<8x16xf32>
    %287 = arith.mulf %276, %256 : vector<8x16xf32>
    %288 = arith.addf %286, %287 : vector<8x16xf32>
    %c24_102 = arith.constant 24 : index
    %c0_103 = arith.constant 0 : index
    %289 = vector.load %arg14[%c24_102, %c0_103] : memref<32x16xf32, #tpu.memory_space<vmem>>, vector<8x16xf32>
    tpu.vector_store %arg14[%c24_102, %c0_103], %288 {strides = array<i32>} : memref<32x16xf32, #tpu.memory_space<vmem>>, vector<8x16xf32>,
    %c0_104 = arith.constant 0 : index
    %c0_105 = arith.constant 0 : index
    %290 = vector.load %arg14[%c0_104, %c0_105] : memref<32x16xf32, #tpu.memory_space<vmem>>, vector<32x16xf32>
    %291 = arith.truncf %290 : vector<32x16xf32> to vector<32x16xbf16>
    %c0_106 = arith.constant 0 : index
    %c0_107 = arith.constant 0 : index
    %292 = vector.load %arg10[%c0_106, %c0_107] : memref<16x128xbf16, #tpu.memory_space<vmem>>, vector<16x128xbf16>
    %cst_108 = arith.constant dense<0.000000e+00> : vector<32x128xf32>
    %293 = tpu.matmul %291, %292, %cst_108 {dimension_numbers = #tpu.dot_dimension_numbers<[1], [0], [0], [1], [0, 0, 1, 1], [], []>} : vector<32x16xbf16>, vector<16x128xbf16>, vector<32x128xf32> -> vector<32x128xf32>
    %c0_109 = arith.constant 0 : index
    %c0_110 = arith.constant 0 : index
    %294 = vector.load %arg11[%c0_109, %c0_110] : memref<1x128xf32, #tpu.memory_space<vmem>>, vector<1x128xf32>
    %295 = vector.broadcast %294 : vector<1x128xf32> to vector<32x128xf32>
    %296 = arith.addf %293, %295 : vector<32x128xf32>
    %297 = vector.extract_strided_slice %296 {offsets = [0, 0], sizes = [8, 128], strides = [1, 1]} : vector<32x128xf32> to vector<8x128xf32>
    %c0_111 = arith.constant 0 : index
    %c0_112 = arith.constant 0 : index
    %c0_113 = arith.constant 0 : index
    %298 = vector.load %arg12[%c0_111, %c0_112, %c0_113] : memref<4x8x128xf32, #tpu.memory_space<vmem>>, vector<1x8x128xf32>
    %299 = vector.shape_cast %298 : vector<1x8x128xf32> to vector<8x128xf32>
    %300 = vector.shape_cast %297 : vector<8x128xf32> to vector<1x8x128xf32>
    tpu.vector_store %arg12[%c0_111, %c0_112, %c0_113], %300 {strides = array<i32>} : memref<4x8x128xf32, #tpu.memory_space<vmem>>, vector<1x8x128xf32>,
    %301 = vector.extract_strided_slice %296 {offsets = [8, 0], sizes = [8, 128], strides = [1, 1]} : vector<32x128xf32> to vector<8x128xf32>
    %c1_114 = arith.constant 1 : index
    %c0_115 = arith.constant 0 : index
    %c0_116 = arith.constant 0 : index
    %302 = vector.load %arg12[%c1_114, %c0_115, %c0_116] : memref<4x8x128xf32, #tpu.memory_space<vmem>>, vector<1x8x128xf32>
    %303 = vector.shape_cast %302 : vector<1x8x128xf32> to vector<8x128xf32>
    %304 = vector.shape_cast %301 : vector<8x128xf32> to vector<1x8x128xf32>
    tpu.vector_store %arg12[%c1_114, %c0_115, %c0_116], %304 {strides = array<i32>} : memref<4x8x128xf32, #tpu.memory_space<vmem>>, vector<1x8x128xf32>,
    %305 = vector.extract_strided_slice %296 {offsets = [16, 0], sizes = [8, 128], strides = [1, 1]} : vector<32x128xf32> to vector<8x128xf32>
    %c2_117 = arith.constant 2 : index
    %c0_118 = arith.constant 0 : index
    %c0_119 = arith.constant 0 : index
    %306 = vector.load %arg12[%c2_117, %c0_118, %c0_119] : memref<4x8x128xf32, #tpu.memory_space<vmem>>, vector<1x8x128xf32>
    %307 = vector.shape_cast %306 : vector<1x8x128xf32> to vector<8x128xf32>
    %308 = vector.shape_cast %305 : vector<8x128xf32> to vector<1x8x128xf32>
    tpu.vector_store %arg12[%c2_117, %c0_118, %c0_119], %308 {strides = array<i32>} : memref<4x8x128xf32, #tpu.memory_space<vmem>>, vector<1x8x128xf32>,
    %309 = vector.extract_strided_slice %296 {offsets = [24, 0], sizes = [8, 128], strides = [1, 1]} : vector<32x128xf32> to vector<8x128xf32>
    %c3_120 = arith.constant 3 : index
    %c0_121 = arith.constant 0 : index
    %c0_122 = arith.constant 0 : index
    %310 = vector.load %arg12[%c3_120, %c0_121, %c0_122] : memref<4x8x128xf32, #tpu.memory_space<vmem>>, vector<1x8x128xf32>
    %311 = vector.shape_cast %310 : vector<1x8x128xf32> to vector<8x128xf32>
    %312 = vector.shape_cast %309 : vector<8x128xf32> to vector<1x8x128xf32>
    tpu.vector_store %arg12[%c3_120, %c0_121, %c0_122], %312 {strides = array<i32>} : memref<4x8x128xf32, #tpu.memory_space<vmem>>, vector<1x8x128xf32>,
    return
  }
  func.func @transform_0(%arg0: i32) -> (i32, i32, i32) {
    %c0_i32 = arith.constant 0 : i32
    %c0_i32_0 = arith.constant 0 : i32
    %c0_i32_1 = arith.constant 0 : i32
    return %c0_i32, %arg0, %c0_i32_0 : i32, i32, i32
  }
  func.func @transform_1(%arg0: i32) -> (i32, i32) {
    %c0_i32 = arith.constant 0 : i32
    %c0_i32_0 = arith.constant 0 : i32
    %c0_i32_1 = arith.constant 0 : i32
    return %c0_i32, %c0_i32_0 : i32, i32
  }
  func.func @transform_2(%arg0: i32) -> (i32, i32) {
    %c0_i32 = arith.constant 0 : i32
    %c0_i32_0 = arith.constant 0 : i32
    %c0_i32_1 = arith.constant 0 : i32
    return %c0_i32, %c0_i32_0 : i32, i32
  }
  func.func @transform_3(%arg0: i32) -> (i32, i32) {
    %c0_i32 = arith.constant 0 : i32
    %c0_i32_0 = arith.constant 0 : i32
    %c0_i32_1 = arith.constant 0 : i32
    return %c0_i32, %c0_i32_0 : i32, i32
  }
  func.func @transform_4(%arg0: i32) -> (i32, i32) {
    %c0_i32 = arith.constant 0 : i32
    %c0_i32_0 = arith.constant 0 : i32
    %c0_i32_1 = arith.constant 0 : i32
    return %c0_i32, %c0_i32_0 : i32, i32
  }
  func.func @transform_5(%arg0: i32) -> (i32, i32) {
    %c0_i32 = arith.constant 0 : i32
    %c0_i32_0 = arith.constant 0 : i32
    %c0_i32_1 = arith.constant 0 : i32
    return %c0_i32, %c0_i32_0 : i32, i32
  }
  func.func @transform_6(%arg0: i32) -> (i32, i32) {
    %c0_i32 = arith.constant 0 : i32
    %c0_i32_0 = arith.constant 0 : i32
    %c0_i32_1 = arith.constant 0 : i32
    return %c0_i32, %c0_i32_0 : i32, i32
  }
  func.func @transform_7(%arg0: i32) -> (i32, i32) {
    %c0_i32 = arith.constant 0 : i32
    %c0_i32_0 = arith.constant 0 : i32
    %c0_i32_1 = arith.constant 0 : i32
    return %c0_i32, %c0_i32_0 : i32, i32
  }
  func.func @transform_8(%arg0: i32) -> (i32, i32) {
    %c0_i32 = arith.constant 0 : i32
    %c0_i32_0 = arith.constant 0 : i32
    %c0_i32_1 = arith.constant 0 : i32
    return %c0_i32, %c0_i32_0 : i32, i32
  }
  func.func @transform_9(%arg0: i32) -> (i32, i32) {
    %c0_i32 = arith.constant 0 : i32
    %c0_i32_0 = arith.constant 0 : i32
    %c0_i32_1 = arith.constant 0 : i32
    return %c0_i32, %c0_i32_0 : i32, i32
  }
  func.func @transform_10(%arg0: i32) -> (i32, i32) {
    %c0_i32 = arith.constant 0 : i32
    %c0_i32_0 = arith.constant 0 : i32
    %c0_i32_1 = arith.constant 0 : i32
    return %c0_i32, %c0_i32_0 : i32, i32
  }
  func.func @transform_11(%arg0: i32) -> (i32, i32, i32) {
    %c0_i32 = arith.constant 0 : i32
    %c0_i32_0 = arith.constant 0 : i32
    %c0_i32_1 = arith.constant 0 : i32
    return %c0_i32, %arg0, %c0_i32_0 : i32, i32, i32
  }
}

</mosaic_0001>

<bundles_post_ra>
// kernel: tpu_custom_call.1
= control target key start
LH: loop header
LB: loop body
LE: loop exit
PB: predicated region body
PF: predicated region fallthrough
CT: control target
= control target key end

     0   :  { %16 = vsyncpa [#allocation6], 0  ;;  %s1648_s0 = inlined_call_operand.hbm [shape: f32[4,8,8], index: 0, kind: input, shape index: {}]   ;;  %s1649_s1 = inlined_call_operand.hbm [shape: bf16[8,48], index: 1, kind: input, shape index: {}]   ;;  %s1650_s2 = inlined_call_operand.hbm [shape: bf16[16,48], index: 2, kind: input, shape index: {}]   ;;  %s1651_s3 = inlined_call_operand.vmem [shape: f32[1,48], index: 3, kind: input, shape index: {}]   ;;  %s1652_s4 = inlined_call_operand.vmem [shape: f32[1,16], index: 4, kind: input, shape index: {}]   ;;  %s1653_s5 = inlined_call_operand.vmem [shape: bf16[16,48], index: 5, kind: input, shape index: {}]   ;;  %s1654_s6 = inlined_call_operand.vmem [shape: bf16[16,48], index: 6, kind: input, shape index: {}]   ;;  %s1655_s7 = inlined_call_operand.hbm [shape: f32[1,48], index: 7, kind: input, shape index: {}]   ;;  %s1656_s8 = inlined_call_operand.vmem [shape: f32[1,16], index: 8, kind: input, shape index: {}]   ;;  %s1657_s9 = inlined_call_operand.vmem [shape: bf16[16,128], index: 9, kind: input, shape index: {}]   ;;  %s1658_s10 = inlined_call_operand.vmem [shape: f32[1,128], index: 10, kind: input, shape index: {}]   ;;  %s1659_s11 = inlined_call_operand.hbm [shape: f32[4,8,128], index: 11, kind: output, shape index: {}]  }
   0x1   :  { %17 = vsyncpa [#allocation9], 0 }
   0x2   :  { %18 = vsyncpa [#allocation12], 0 }
   0x3   :  { %19 = vsyncpa [#allocation7], 0  ;;  %s1333_s17 = smov [#allocation8]   ;;  %s1334_s19 = smov [#allocation5]  }
   0x4   :  { %s38_s18 = sshll.u32 %s1333_s17, 4  ;;  %s25_s20 = sshll.u32 %s1334_s19, 4  ;;  %s39_s18 = int_to_ptr.vmem [resolvable:$true] %s38_s18  ;;  %s1408_s20 = int_to_ptr.vmem [resolvable:$true] %s25_s20 }
   0x5   :  { %s1215_s23 = scalar_lea.hbm %s1649_s1, 64 }
   0x6   :  { %p1216_p0 = scmp.ne.s32.totalorder %s1649_s1, %s1215_s23  ;;  %p1219_p1 = scmp.lt.u32.totalorder %s1215_s23, %s1649_s1 }
   0x8   :  { %p1221_p2 = pnand %p1219_p1, %p1216_p0 }
   0xa   :  { %1224 = shalt.err (!%p1221_p2)
}
   0xb   :  { %s1225_s28 = scalar_lea.vmem %s39_s18, 64  ;;  %p1230_p4 = scmp.lt.s32.totalorder %s39_s18, %s39_s18 }
   0xc   :  { %p1226_p3 = scmp.ne.s32.totalorder %s39_s18, %s1225_s28  ;;  %p1231_p5 = scmp.lt.s32.totalorder %s1225_s28, %s1225_s28 }
   0xe   :  { %p1232_p6 = por %p1231_p5, %p1230_p4 }
  0x10   :  { %p1233_p7 = pnand %p1232_p6, %p1226_p3 }
  0x12   :  { %1236 = shalt.err (!%p1233_p7)
}
  0x13   :  { %41 = dma.hbm_to_vmem [thread:$0]  %s1649_s1, 64, %s39_s18, [#allocation9]  }
  0x14   :  { %s1237_s14 = scalar_lea.hbm %s1648_s0, 512 }
  0x15   :  { %p1238_p8 = scmp.ne.s32.totalorder %s1648_s0, %s1237_s14  ;;  %p1241_p9 = scmp.lt.u32.totalorder %s1237_s14, %s1648_s0 }
  0x17   :  { %p1243_p10 = pnand %p1241_p9, %p1238_p8 }
  0x19   :  { %1246 = shalt.err (!%p1243_p10)
}
  0x1a   :  { %s1247_s21 = scalar_lea.vmem %s1408_s20, 512  ;;  %p1252_p12 = scmp.lt.s32.totalorder %s1408_s20, %s1408_s20 }
  0x1b   :  { %p1248_p11 = scmp.ne.s32.totalorder %s1408_s20, %s1247_s21  ;;  %p1253_p13 = scmp.lt.s32.totalorder %s1247_s21, %s1247_s21 }
  0x1d   :  { %p1254_p0 = por %p1253_p13, %p1252_p12 }
  0x1f   :  { %p1255_p1 = pnand %p1254_p0, %p1248_p11 }
  0x21   :  { %1258 = shalt.err (!%p1255_p1)
}
  0x22   :  { %s1335_s1 = smov 128   ;;  %s1336_s18 = smov 8  }
  0x23   :  { %31 = dma.hbm_to_vmem [thread:$0]  %s1648_s0, 512, %s1408_s20, [#allocation6], %s1335_s1, %s1335_s1, %s1336_s18  }
  0x24   :  { %s1337_s24 = smov [#allocation10]   ;;  %s1259_s28 = scalar_lea.hbm %s1650_s2, 128 }
  0x25   :  { %s47_s25 = sshll.u32 %s1337_s24, 4  ;;  %p1260_p2 = scmp.ne.s32.totalorder %s1650_s2, %s1259_s28  ;;  %s48_s25 = int_to_ptr.vmem [resolvable:$true] %s47_s25 }
  0x26   :  { %p1263_p3 = scmp.lt.u32.totalorder %s1259_s28, %s1650_s2 }
  0x28   :  { %p1265_p4 = pnand %p1263_p3, %p1260_p2 }
  0x2a   :  { %1268 = shalt.err (!%p1265_p4)
}
  0x2b   :  { %s1269_s14 = scalar_lea.vmem %s48_s25, 128  ;;  %p1274_p6 = scmp.lt.s32.totalorder %s48_s25, %s48_s25 }
  0x2c   :  { %p1270_p5 = scmp.ne.s32.totalorder %s48_s25, %s1269_s14  ;;  %p1275_p7 = scmp.lt.s32.totalorder %s1269_s14, %s1269_s14 }
  0x2e   :  { %p1276_p8 = por %p1275_p7, %p1274_p6 }
  0x30   :  { %p1277_p9 = pnand %p1276_p8, %p1270_p5 }
  0x32   :  { %1280 = shalt.err (!%p1277_p9)
}
  0x33   :  { %s1338_s0 = smov 64   ;;  %s1339_s20 = smov 4  }
  0x34   :  { %53 = dma.hbm_to_vmem [thread:$0]  %s1650_s2, 128, %s48_s25, [#allocation9], %s1338_s0, %s1338_s0, %s1339_s20  }
  0x35   :  { %s1340_s17 = smov [#allocation11]   ;;  %s1281_s23 = scalar_lea.hbm %s1655_s7, 16 }
  0x36   :  { %s68_s19 = sshll.u32 %s1340_s17, 4  ;;  %p1282_p10 = scmp.ne.s32.totalorder %s1655_s7, %s1281_s23  ;;  %s69_s19 = int_to_ptr.vmem [resolvable:$true] %s68_s19 }
  0x37   :  { %p1285_p11 = scmp.lt.u32.totalorder %s1281_s23, %s1655_s7 }
  0x39   :  { %p1287_p12 = pnand %p1285_p11, %p1282_p10 }
  0x3b   :  { %1290 = shalt.err (!%p1287_p12)
}
  0x3c   :  { %s1291_s29 = scalar_lea.vmem %s69_s19, 16  ;;  %s1295_s2 = scalar_lea.vmem %s69_s19, 32 }
  0x3d   :  { %p1292_p13 = scmp.ne.s32.totalorder %s69_s19, %s1291_s29  ;;  %p1296_p0 = scmp.lt.s32.totalorder %s69_s19, %s69_s19 }
  0x3e   :  { %p1297_p1 = scmp.lt.s32.totalorder %s1295_s2, %s1291_s29 }
  0x40   :  { %p1298_p2 = por %p1297_p1, %p1296_p0 }
  0x42   :  { %p1299_p3 = pnand %p1298_p2, %p1292_p13 }
  0x44   :  { %1302 = shalt.err (!%p1299_p3)
}
  0x45   :  { %71 = dma.hbm_to_vmem [thread:$0]  %s1655_s7, 16, %s69_s19, [#allocation12]  }
  0x46   :  { %1325 = dma.done.wait [#allocation6], 512  }
  0x47   :  { %1326 = vsyncadd [#allocation6], 4294966784 }
  0x48   :  { %1327 = dma.done.wait [#allocation9], 192  }
  0x49   :  { %1328 = vsyncadd [#allocation9], 4294967104 }
  0x4a   :  { %1329 = dma.done.wait [#allocation12], 16  }
  0x4b   :  { %1330 = vsyncadd [#allocation12], 4294967280  ;;  %v1341_v0 = vmov 0.0   ;;  %vm1342_vm0 = vmmov 0   ;;  %vm126_vm1 = vcmask 1043456   ;;  %vm92_vm2 = vcmask 64512  }
  0x4c   :  { %1087 = vmatprep.subr.bf16.mxu1 %v1341_v0  ;;  %1089 = vmatprep.mubr.msk.bf16.mxu1 %vm1342_vm0, %v1341_v0  ;;  %v1469_v1 = vld [vmem:[#allocation10] sm:$0xff]   ;;  %v107_v2 = vld [vmem:[#allocation8] sm:$0xf]  ;;  %v98_v6 = vld [vmem:[#allocation5 + $0x10] sm:$0xff]  ;;  %s1343_s13 = smov 32   ;;  %v1344_v9 = vmov 0  }
  0x4d   :  { %v91_v3 = vld [vmem:[#allocation5] sm:$0xff]  ;;  %v95_v4 = vld [vmem:[#allocation5 + $0x8] sm:$0xff]  ;;  %1088 = vmatpush3.bf16.msra.mxu1 %v1469_v1  ;;  %1147 = vmatprep.subr.msk.bf16.mxu0 %vm126_vm1, %v107_v2  ;;  %v128_v5 = vsel %vm126_vm1, %v107_v2, 0  ;;  %v101_v7 = vld [vmem:[#allocation5 + $0x18] sm:$0xff]  ;;  %99 = vst.msk [vmem:[#allocation4 + $0x10] sm:$0xff] %vm92_vm2, %v98_v6  ;;  %vm179_vm3 = vcmask 392192  }
  0x4e   :  { %93 = vst.msk [vmem:[#allocation4] sm:$0xff] %vm92_vm2, %v91_v3  ;;  %96 = vst.msk [vmem:[#allocation4 + $0x8] sm:$0xff] %vm92_vm2, %v95_v4  ;;  %v1032_v8 = vld [vmem:[%s1652_s4] ss:$0 sm:$0xff]  ;;  %1082 = vmatpush3.bf16.msra.mxu0 %v128_v5  ;;  %1099 = vmatprep.subr.bf16.mxu1 %v1341_v0  ;;  %s1345_s4 = smov 96   ;;  %vm191_vm4 = vcmask 130048  }
  0x4f   :  { %102 = vst.msk [vmem:[#allocation4 + $0x18] sm:$0xff] %vm92_vm2, %v101_v7  ;;  %247 = vrot.lane.b32.xlu0 %v1032_v8, %s1343_s13  ;;  %1093 = vmatprep.subr.bf16.mxu0 %v1341_v0  ;;  %v1027_v22 = vld [vmem:[%s1651_s3] ss:$0 sm:$0xff]  ;;  %s1346_s3 = smov 112   ;;  %s1347_s22 = smov [#allocation13]  }
  0x50   :  { %1090 = vmatmul.mubr.bf16.vlgmr.msra.gmra.mrb[0].mxu1 %v1344_v9  ;;  %s1013_s23 = sshll.u32 %s1347_s22, 4  ;;  %s1014_s23 = int_to_ptr.vmem [resolvable:$true] %s1013_s23 }
  0x51   :  { %1100 = vmatpush3.bf16.msra.mxu1 %v1469_v1  ;;  %1101 = vmatprep.mubr.msk.bf16.mxu1 %vm1342_vm0, %v1341_v0  ;;  %s1303_s24 = scalar_lea.vmem %s1014_s23, 512  ;;  %p1308_p5 = scmp.lt.s32.totalorder %s1014_s23, %s1014_s23 }
  0x52   :  { %p1304_p4 = scmp.ne.s32.totalorder %s1014_s23, %s1303_s24  ;;  %p1309_p6 = scmp.lt.s32.totalorder %s1303_s24, %s1303_s24 }
  0x54   :  { %v105_v13 = vld [vmem:[#allocation4 + $0x10] sm:$0xff]  ;;  %p1310_p7 = por %p1309_p6, %p1308_p5 }
  0x55   :  { %v103_v10 = vld [vmem:[#allocation4] sm:$0xff]  ;;  %v104_v11 = vld [vmem:[#allocation4 + $0x8] sm:$0xff] }
  0x56   :  { %v112_v12 = vpack.c.bf16 %v104_v11, %v103_v10  ;;  %v106_v14 = vld [vmem:[#allocation4 + $0x18] sm:$0xff]  ;;  %p1311_p8 = pnand %p1310_p7, %p1304_p4 }
  0x57   :  { %v113_v15 = vpack.c.bf16 %v106_v14, %v105_v13 }
  0x58   :  { %1083 = vmatprep.mubr.msk.bf16.mxu0 %vm92_vm2, %v112_v12 }
  0x59   :  { %1084 = vmatmul.mubr.msk.bf16.vlgmr.msra.gmra.mrb[0].mxu0 %vm92_vm2, %v113_v15 }
  0x5a   :  { %1094 = vmatpush3.bf16.msra.mxu0 %v1469_v1  ;;  %1095 = vmatprep.mubr.msk.bf16.mxu0 %vm1342_vm0, %v1341_v0 }
  0x5b   :  { %1105 = vmatprep.subr.bf16.mxu0 %v1341_v0 }
  0xc1   :  { %v1492_v16 = vpop.permute.xlu0 %247 }
 0x123   :  { %v229_v17 = vpop.f32.mrb[0].mxu1 }
 0x124   :  { %v250_v18 = vadd.f32 %v1492_v16, %v229_v17  ;;  %v1091_v19 = vpop.f32.mrb[1].mxu1 }
 0x125   :  { %v232_v20 = vpop.f32.mrb[2].mxu1 }
 0x126   :  { %252 = vrot.lane.b32.xlu0 %v250_v18, %s1345_s4  ;;  %v1092_v21 = vpop.f32.mrb[3].mxu1 }
 0x12c   :  { %v1085_v23 = vpop.f32.mrb[0].mxu0 }
 0x12d   :  { %v173_v24 = vadd.f32 %v1085_v23, %v1027_v22  ;;  %v164_v25 = vpop.f32.mrb[1].mxu0 }
 0x12e   :  { %v165_v26 = vadd.f32 %v1027_v22, %v164_v25  ;;  %v1086_v27 = vpop.f32.mrb[2].mxu0 }
 0x12f   :  { %182 = vst.msk [vmem:[#allocation2 + $0x10] sm:$0xff] %vm179_vm3, %v173_v24  ;;  %v176_v28 = vadd.f32 %v1086_v27, %v1027_v22  ;;  %v167_v29 = vpop.f32.mrb[3].mxu0 }
 0x130   :  { %180 = vst.msk [vmem:[#allocation2] sm:$0xff] %vm179_vm3, %v165_v26  ;;  %v168_v30 = vadd.f32 %v1027_v22, %v167_v29 }
 0x131   :  { %183 = vst.msk [vmem:[#allocation2 + $0x18] sm:$0xff] %vm179_vm3, %v176_v28 }
 0x132   :  { %181 = vst.msk [vmem:[#allocation2 + $0x8] sm:$0xff] %vm179_vm3, %v168_v30 }
 0x136   :  { %v355_v15 = vld [vmem:[#allocation2 + $0x10] sm:$0xff] }
 0x137   :  { %v184_v31 = vld [vmem:[#allocation2] sm:$0xff] }
 0x138   :  { %v235_v32 = vadd.f32 %v229_v17, %v184_v31 }
 0x139   :  { %v275_v54 = vld [vmem:[#allocation2 + $0x8] sm:$0xff] }
 0x13a   :  { %v1031_v33 = vmul.f32 -1.442695, %v235_v32 }
 0x13c   :  { %1167 = vpow2.f32 %v1031_v33 }
 0x146   :  { %v1168_v34 = vpop.eup %1167 }
 0x147   :  { %v239_v35 = vadd.f32 1.0, %v1168_v34 }
 0x149   :  { %1169 = vrcp.f32 %v239_v35 }
 0x153   :  { %v1170_v36 = vpop.eup %1169 }
 0x154   :  { %v262_v42 = vsub.f32 1.0, %v1170_v36  ;;  %v268_v44 = vmul.f32 0.0, %v1170_v36 }
 0x198   :  { %v253_v37 = vpop.permute.xlu0 %252 }
 0x199   :  { %v255_v38 = vmul.f32 %v1170_v36, %v253_v37 }
 0x19b   :  { %257 = vrot.lane.b32.xlu1 %v255_v38, %s1343_s13 }
 0x20d   :  { %v258_v39 = vpop.permute.xlu1 %257 }
 0x20e   :  { %v260_v40 = vadd.f32 %v258_v39, %v184_v31  ;;  %v435_v39 = vld [vmem:[#allocation2 + $0x18] sm:$0xff] }
 0x210   :  { %1171 = vtanh.f32 %v260_v40 }
 0x21a   :  { %v1172_v41 = vpop.eup %1171 }
 0x21b   :  { %264 = vrot.lane.b32.xlu1 %v1172_v41, %s1346_s3 }
 0x28d   :  { %v265_v43 = vpop.permute.xlu1 %264 }
 0x28e   :  { %v267_v45 = vmul.f32 %v265_v43, %v262_v42 }
 0x290   :  { %v1505_v46 = vadd.f32 %v268_v44, %v267_v45 }
 0x292   :  { %v276_v47 = vpack.c.bf16 %v1505_v46, %v1505_v46 }
 0x294   :  { %278 = vrot.lane.b32.xlu0 %v276_v47, %s1346_s3 }
 0x306   :  { %v279_v48 = vpop.permute.xlu0 %278 }
 0x307   :  { %1096 = vmatmul.mubr.msk.bf16.vlgmr.msra.gmra.mrb[4].mxu0 %vm191_vm4, %v279_v48 }
 0x308   :  { %1106 = vmatpush3.bf16.msra.mxu0 %v1469_v1  ;;  %1107 = vmatprep.mubr.msk.bf16.mxu0 %vm1342_vm0, %v1341_v0 }
 0x309   :  { %1117 = vmatprep.subr.bf16.mxu0 %v1341_v0 }
 0x3da   :  { %v317_v49 = vpop.f32.mrb[4].mxu0 }
 0x3db   :  { %v330_v50 = vadd.f32 %v317_v49, %v1492_v16  ;;  %v1097_v51 = vpop.f32.mrb[5].mxu0  ;;  %v323_v55 = vadd.f32 %v317_v49, %v275_v54 }
 0x3dc   :  { %v320_v52 = vpop.f32.mrb[6].mxu0 }
 0x3dd   :  { %332 = vrot.lane.b32.xlu1 %v330_v50, %s1345_s4  ;;  %v1098_v53 = vpop.f32.mrb[7].mxu0  ;;  %v1034_v56 = vmul.f32 -1.442695, %v323_v55  ;;  %v1547_v52 = vld [vmem:[%s1654_s6] sm:$0xff]  }
 0x3df   :  { %1173 = vpow2.f32 %v1034_v56 }
 0x3e9   :  { %v1174_v57 = vpop.eup %1173 }
 0x3ea   :  { %v327_v58 = vadd.f32 1.0, %v1174_v57 }
 0x3ec   :  { %1175 = vrcp.f32 %v327_v58 }
 0x3f6   :  { %v1176_v59 = vpop.eup %1175 }
 0x3f7   :  { %v342_v2 = vsub.f32 1.0, %v1176_v59  ;;  %v348_v4 = vmul.f32 %v1176_v59, %v1505_v46 }
 0x44f   :  { %v333_v60 = vpop.permute.xlu1 %332 }
 0x450   :  { %v335_v61 = vmul.f32 %v1176_v59, %v333_v60 }
 0x452   :  { %337 = vrot.lane.b32.xlu0 %v335_v61, %s1343_s13 }
 0x4c4   :  { %v338_v62 = vpop.permute.xlu0 %337 }
 0x4c5   :  { %v340_v63 = vadd.f32 %v338_v62, %v275_v54 }
 0x4c7   :  { %1177 = vtanh.f32 %v340_v63 }
 0x4d1   :  { %v1178_v1 = vpop.eup %1177 }
 0x4d2   :  { %344 = vrot.lane.b32.xlu1 %v1178_v1, %s1346_s3 }
 0x544   :  { %v345_v3 = vpop.permute.xlu1 %344 }
 0x545   :  { %v347_v5 = vmul.f32 %v345_v3, %v342_v2 }
 0x547   :  { %v1520_v6 = vadd.f32 %v348_v4, %v347_v5 }
 0x549   :  { %v356_v7 = vpack.c.bf16 %v1520_v6, %v1520_v6 }
 0x54b   :  { %358 = vrot.lane.b32.xlu0 %v356_v7, %s1346_s3 }
 0x5bd   :  { %v359_v8 = vpop.permute.xlu0 %358 }
 0x5be   :  { %1102 = vmatmul.mubr.msk.bf16.vlgmr.msra.gmra.mrb[4].mxu1 %vm191_vm4, %v359_v8 }
 0x691   :  { %v397_v10 = vpop.f32.mrb[4].mxu1 }
 0x692   :  { %v410_v11 = vadd.f32 %v397_v10, %v1492_v16  ;;  %v1103_v12 = vpop.f32.mrb[5].mxu1  ;;  %v403_v17 = vadd.f32 %v397_v10, %v355_v15  ;;  %v1039_v10 = vld [vmem:[#allocation11] ss:$0 sm:$0xff] }
 0x693   :  { %v400_v13 = vpop.f32.mrb[6].mxu1 }
 0x694   :  { %412 = vrot.lane.b32.xlu1 %v410_v11, %s1345_s4  ;;  %v1104_v14 = vpop.f32.mrb[7].mxu1  ;;  %v1036_v18 = vmul.f32 -1.442695, %v403_v17 }
 0x696   :  { %1179 = vpow2.f32 %v1036_v18 }
 0x6a0   :  { %v1180_v19 = vpop.eup %1179 }
 0x6a1   :  { %v407_v20 = vadd.f32 1.0, %v1180_v19 }
 0x6a3   :  { %1181 = vrcp.f32 %v407_v20 }
 0x6ad   :  { %v1182_v21 = vpop.eup %1181 }
 0x6ae   :  { %v422_v27 = vsub.f32 1.0, %v1182_v21  ;;  %v428_v29 = vmul.f32 %v1182_v21, %v1520_v6 }
 0x706   :  { %v413_v22 = vpop.permute.xlu1 %412 }
 0x707   :  { %v415_v23 = vmul.f32 %v1182_v21, %v413_v22 }
 0x709   :  { %417 = vrot.lane.b32.xlu0 %v415_v23, %s1343_s13 }
 0x77b   :  { %v418_v24 = vpop.permute.xlu0 %417 }
 0x77c   :  { %v420_v25 = vadd.f32 %v418_v24, %v355_v15 }
 0x77e   :  { %1183 = vtanh.f32 %v420_v25 }
 0x788   :  { %v1184_v26 = vpop.eup %1183 }
 0x789   :  { %424 = vrot.lane.b32.xlu1 %v1184_v26, %s1346_s3 }
 0x7fb   :  { %v425_v28 = vpop.permute.xlu1 %424 }
 0x7fc   :  { %v427_v30 = vmul.f32 %v425_v28, %v422_v27 }
 0x7fe   :  { %v429_v31 = vadd.f32 %v428_v29, %v427_v30 }
 0x800   :  { %v436_v32 = vpack.c.bf16 %v429_v31, %v429_v31 }
 0x802   :  { %438 = vrot.lane.b32.xlu0 %v436_v32, %s1346_s3 }
 0x874   :  { %v439_v33 = vpop.permute.xlu0 %438 }
 0x875   :  { %1108 = vmatmul.mubr.msk.bf16.vlgmr.msra.gmra.mrb[8].mxu0 %vm191_vm4, %v439_v33 }
 0x876   :  { %1119 = vmatprep.mubr.msk.bf16.mxu0 %vm1342_vm0, %v1341_v0  ;;  %1118 = vmatpush3.bf16.msra.mxu0 %v1547_v52 }
 0x877   :  { %1129 = vmatprep.subr.bf16.mxu0 %v1341_v0 }
 0x87d   :  { %1120 = vmatmul.mubr.bf16.vlgmr.msra.gmra.mrb[12].mxu0 %v1344_v9  ;;  %v1045_v9 = vld [vmem:[%s1656_s8] ss:$0 sm:$0xff] }
 0x87e   :  { %1130 = vmatpush3.bf16.msra.mxu0 %v1547_v52  ;;  %1131 = vmatprep.mubr.msk.bf16.mxu0 %vm1342_vm0, %v1341_v0 }
 0x948   :  { %v477_v34 = vpop.f32.mrb[8].mxu0 }
 0x949   :  { %v490_v35 = vadd.f32 %v477_v34, %v1492_v16  ;;  %v1109_v36 = vpop.f32.mrb[9].mxu0  ;;  %v483_v40 = vadd.f32 %v477_v34, %v435_v39 }
 0x94a   :  { %v480_v37 = vpop.f32.mrb[10].mxu0 }
 0x94b   :  { %492 = vrot.lane.b32.xlu1 %v490_v35, %s1345_s4  ;;  %v1110_v38 = vpop.f32.mrb[11].mxu0  ;;  %v1038_v41 = vmul.f32 -1.442695, %v483_v40 }
 0x94d   :  { %1185 = vpow2.f32 %v1038_v41 }
 0x950   :  { %v639_v62 = vpop.f32.mrb[12].mxu0 }
 0x951   :  { %v1121_v63 = vpop.f32.mrb[13].mxu0 }
 0x952   :  { %v642_v1 = vpop.f32.mrb[14].mxu0 }
 0x953   :  { %v1122_v2 = vpop.f32.mrb[15].mxu0 }
 0x957   :  { %v1186_v42 = vpop.eup %1185 }
 0x958   :  { %v487_v43 = vadd.f32 1.0, %v1186_v42 }
 0x95a   :  { %1187 = vrcp.f32 %v487_v43 }
 0x964   :  { %v1188_v44 = vpop.eup %1187 }
 0x965   :  { %v502_v53 = vsub.f32 1.0, %v1188_v44  ;;  %v508_v55 = vmul.f32 %v1188_v44, %v429_v31 }
 0x9bd   :  { %v493_v45 = vpop.permute.xlu1 %492 }
 0x9be   :  { %v495_v47 = vmul.f32 %v1188_v44, %v493_v45 }
 0x9c0   :  { %497 = vrot.lane.b32.xlu0 %v495_v47, %s1343_s13 }
 0x9c4   :  { %271 = vrot.lane.b32.xlu0 %v1505_v46, %s1346_s3  ;;  %v1165_v46 = vld [vmem:[%s1653_s5] sm:$0xff]  }
 0x9c5   :  { %1111 = vmatprep.subr.bf16.mxu1 %v1165_v46 }
 0x9c6   :  { %1112 = vmatpush3.bf16.msra.mxu1 %v1165_v46 }
 0x9c7   :  { %1123 = vmatprep.subr.bf16.mxu1 %v1341_v0 }
 0x9c8   :  { %431 = vrot.lane.b32.xlu0 %v429_v31, %s1346_s3 }
 0x9cc   :  { %657 = vrot.lane.b32.xlu0 %v1045_v9, %s1343_s13 }
 0xa32   :  { %v498_v16 = vpop.permute.xlu0 %497 }
 0xa33   :  { %v500_v48 = vadd.f32 %v498_v16, %v435_v39 }
 0xa35   :  { %1189 = vtanh.f32 %v500_v48 }
 0xa36   :  { %v272_v49 = vpop.permute.xlu0 %271 }
 0xa37   :  { %274 = vst.msk [vmem:[#allocation3] sm:$0xff] %vm191_vm4, %v272_v49 }
 0xa3a   :  { %v432_v50 = vpop.permute.xlu0 %431 }
 0xa3b   :  { %434 = vst.msk [vmem:[#allocation3 + $0x10] sm:$0xff] %vm191_vm4, %v432_v50 }
 0xa3e   :  { %v515_v59 = vld [vmem:[#allocation3] sm:$0xff]  ;;  %v1568_v3 = vpop.permute.xlu0 %657 }
 0xa3f   :  { %v1190_v51 = vpop.eup %1189  ;;  %v660_v4 = vadd.f32 %v1568_v3, %v639_v62 }
 0xa40   :  { %504 = vrot.lane.b32.xlu1 %v1190_v51, %s1346_s3 }
 0xa44   :  { %351 = vrot.lane.b32.xlu1 %v1520_v6, %s1346_s3  ;;  %v517_v6 = vld [vmem:[#allocation3 + $0x10] sm:$0xff] }
 0xab2   :  { %v505_v54 = vpop.permute.xlu1 %504 }
 0xab3   :  { %v507_v56 = vmul.f32 %v505_v54, %v502_v53 }
 0xab5   :  { %v509_v57 = vadd.f32 %v508_v55, %v507_v56 }
 0xab6   :  { %v352_v58 = vpop.permute.xlu1 %351 }
 0xab7   :  { %354 = vst.msk [vmem:[#allocation3 + $0x8] sm:$0xff] %vm191_vm4, %v352_v58  ;;  %511 = vrot.lane.b32.xlu1 %v509_v57, %s1346_s3 }
 0xabb   :  { %662 = vrot.lane.b32.xlu1 %v660_v4, %s1345_s4 }
 0xabe   :  { %v516_v60 = vld [vmem:[#allocation3 + $0x8] sm:$0xff] }
 0xabf   :  { %v525_v61 = vpack.c.bf16 %v516_v60, %v515_v59 }
 0xac1   :  { %1113 = vmatprep.mubr.msk.bf16.mxu1 %vm191_vm4, %v525_v61 }
 0xb29   :  { %v512_v5 = vpop.permute.xlu1 %511 }
 0xb2a   :  { %514 = vst.msk [vmem:[#allocation3 + $0x18] sm:$0xff] %vm191_vm4, %v512_v5 }
 0xb2d   :  { %v663_v25 = vpop.permute.xlu1 %662 }
 0xb31   :  { %v518_v7 = vld [vmem:[#allocation3 + $0x18] sm:$0xff] }
 0xb32   :  { %v526_v8 = vpack.c.bf16 %v518_v7, %v517_v6 }
 0xb34   :  { %1114 = vmatmul.mubr.msk.bf16.vlgmr.msra.gmra.mrb[8].mxu1 %vm191_vm4, %v526_v8 }
 0xb35   :  { %1124 = vmatpush3.bf16.msra.mxu1 %v1547_v52  ;;  %1125 = vmatprep.mubr.msk.bf16.mxu1 %vm1342_vm0, %v1341_v0 }
 0xb36   :  { %1135 = vmatprep.subr.bf16.mxu1 %v1341_v0 }
 0xc07   :  { %v1115_v11 = vpop.f32.mrb[8].mxu1 }
 0xc08   :  { %v588_v12 = vadd.f32 %v1115_v11, %v1039_v10  ;;  %v579_v13 = vpop.f32.mrb[9].mxu1 }
 0xc09   :  { %v580_v14 = vadd.f32 %v1039_v10, %v579_v13  ;;  %v1116_v15 = vpop.f32.mrb[10].mxu1 }
 0xc0a   :  { %596 = vst.msk [vmem:[#allocation2 + $0x10] sm:$0xff] %vm179_vm3, %v588_v12  ;;  %v591_v17 = vadd.f32 %v1116_v15, %v1039_v10  ;;  %v582_v18 = vpop.f32.mrb[11].mxu1 }
 0xc0b   :  { %594 = vst.msk [vmem:[#allocation2] sm:$0xff] %vm179_vm3, %v580_v14  ;;  %v583_v19 = vadd.f32 %v1039_v10, %v582_v18 }
 0xc0c   :  { %597 = vst.msk [vmem:[#allocation2 + $0x18] sm:$0xff] %vm179_vm3, %v591_v17 }
 0xc0d   :  { %595 = vst.msk [vmem:[#allocation2 + $0x8] sm:$0xff] %vm179_vm3, %v583_v19 }
 0xc11   :  { %v765_v63 = vld [vmem:[#allocation2 + $0x10] sm:$0xff] }
 0xc12   :  { %v598_v20 = vld [vmem:[#allocation2] sm:$0xff] }
 0xc13   :  { %v645_v21 = vadd.f32 %v639_v62, %v598_v20 }
 0xc14   :  { %v685_v43 = vld [vmem:[#allocation2 + $0x8] sm:$0xff] }
 0xc15   :  { %v1044_v22 = vmul.f32 -1.442695, %v645_v21 }
 0xc17   :  { %1191 = vpow2.f32 %v1044_v22 }
 0xc21   :  { %v1192_v23 = vpop.eup %1191 }
 0xc22   :  { %v649_v24 = vadd.f32 1.0, %v1192_v23 }
 0xc24   :  { %1193 = vrcp.f32 %v649_v24 }
 0xc2e   :  { %v1194_v26 = vpop.eup %1193 }
 0xc2f   :  { %v665_v27 = vmul.f32 %v1194_v26, %v663_v25  ;;  %v672_v31 = vsub.f32 1.0, %v1194_v26  ;;  %v678_v33 = vmul.f32 0.0, %v1194_v26  ;;  %v845_v26 = vld [vmem:[#allocation2 + $0x18] sm:$0xff] }
 0xc31   :  { %667 = vrot.lane.b32.xlu0 %v665_v27, %s1343_s13 }
 0xca3   :  { %v668_v28 = vpop.permute.xlu0 %667 }
 0xca4   :  { %v670_v29 = vadd.f32 %v668_v28, %v598_v20 }
 0xca6   :  { %1195 = vtanh.f32 %v670_v29 }
 0xcb0   :  { %v1196_v30 = vpop.eup %1195 }
 0xcb1   :  { %674 = vrot.lane.b32.xlu1 %v1196_v30, %s1346_s3 }
 0xd23   :  { %v675_v32 = vpop.permute.xlu1 %674 }
 0xd24   :  { %v677_v34 = vmul.f32 %v675_v32, %v672_v31 }
 0xd26   :  { %v1584_v35 = vadd.f32 %v678_v33, %v677_v34 }
 0xd28   :  { %v686_v36 = vpack.c.bf16 %v1584_v35, %v1584_v35 }
 0xd2a   :  { %688 = vrot.lane.b32.xlu0 %v686_v36, %s1346_s3 }
 0xd9c   :  { %v689_v37 = vpop.permute.xlu0 %688 }
 0xd9d   :  { %1126 = vmatmul.mubr.msk.bf16.vlgmr.msra.gmra.mrb[12].mxu1 %vm191_vm4, %v689_v37 }
 0xd9e   :  { %1136 = vmatpush3.bf16.msra.mxu1 %v1547_v52  ;;  %1137 = vmatprep.mubr.msk.bf16.mxu1 %vm1342_vm0, %v1341_v0 }
 0xe70   :  { %v727_v38 = vpop.f32.mrb[12].mxu1 }
 0xe71   :  { %v740_v39 = vadd.f32 %v727_v38, %v1568_v3  ;;  %v1127_v40 = vpop.f32.mrb[13].mxu1  ;;  %v733_v44 = vadd.f32 %v727_v38, %v685_v43 }
 0xe72   :  { %v730_v41 = vpop.f32.mrb[14].mxu1 }
 0xe73   :  { %742 = vrot.lane.b32.xlu1 %v740_v39, %s1345_s4  ;;  %v1128_v42 = vpop.f32.mrb[15].mxu1  ;;  %v1047_v45 = vmul.f32 -1.442695, %v733_v44 }
 0xe75   :  { %1197 = vpow2.f32 %v1047_v45 }
 0xe7f   :  { %v1198_v47 = vpop.eup %1197 }
 0xe80   :  { %v737_v16 = vadd.f32 1.0, %v1198_v47 }
 0xe82   :  { %1199 = vrcp.f32 %v737_v16 }
 0xe8c   :  { %v1200_v48 = vpop.eup %1199 }
 0xe8d   :  { %v752_v46 = vsub.f32 1.0, %v1200_v48  ;;  %v758_v54 = vmul.f32 %v1200_v48, %v1584_v35 }
 0xee5   :  { %v743_v49 = vpop.permute.xlu1 %742 }
 0xee6   :  { %v745_v50 = vmul.f32 %v1200_v48, %v743_v49 }
 0xee8   :  { %747 = vrot.lane.b32.xlu0 %v745_v50, %s1343_s13 }
 0xf5a   :  { %v748_v0 = vpop.permute.xlu0 %747 }
 0xf5b   :  { %v750_v51 = vadd.f32 %v748_v0, %v685_v43 }
 0xf5d   :  { %1201 = vtanh.f32 %v750_v51  ;;  %v1052_v51 = vld [vmem:[%s1658_s10] ss:$0 sm:$0xff] }
 0xf67   :  { %v1202_v52 = vpop.eup %1201 }
 0xf68   :  { %754 = vrot.lane.b32.xlu1 %v1202_v52, %s1346_s3 }
 0xfda   :  { %v755_v53 = vpop.permute.xlu1 %754 }
 0xfdb   :  { %v757_v55 = vmul.f32 %v755_v53, %v752_v46 }
 0xfdd   :  { %v1598_v56 = vadd.f32 %v758_v54, %v757_v55 }
 0xfdf   :  { %v766_v9 = vpack.c.bf16 %v1598_v56, %v1598_v56 }
 0xfe1   :  { %768 = vrot.lane.b32.xlu0 %v766_v9, %s1346_s3 }
0x1053   :  { %v769_v57 = vpop.permute.xlu0 %768 }
0x1054   :  { %1132 = vmatmul.mubr.msk.bf16.vlgmr.msra.gmra.mrb[16].mxu0 %vm191_vm4, %v769_v57 }
0x1127   :  { %v807_v58 = vpop.f32.mrb[16].mxu0 }
0x1128   :  { %v820_v59 = vadd.f32 %v807_v58, %v1568_v3  ;;  %v1133_v60 = vpop.f32.mrb[17].mxu0  ;;  %v813_v1 = vadd.f32 %v807_v58, %v765_v63 }
0x1129   :  { %v810_v61 = vpop.f32.mrb[18].mxu0 }
0x112a   :  { %822 = vrot.lane.b32.xlu1 %v820_v59, %s1345_s4  ;;  %v1134_v62 = vpop.f32.mrb[19].mxu0  ;;  %v1049_v2 = vmul.f32 -1.442695, %v813_v1 }
0x112c   :  { %1203 = vpow2.f32 %v1049_v2 }
0x1136   :  { %v1204_v4 = vpop.eup %1203 }
0x1137   :  { %v817_v5 = vadd.f32 1.0, %v1204_v4 }
0x1139   :  { %1205 = vrcp.f32 %v817_v5 }
0x1143   :  { %v1206_v6 = vpop.eup %1205 }
0x1144   :  { %v832_v13 = vsub.f32 1.0, %v1206_v6  ;;  %v838_v15 = vmul.f32 %v1206_v6, %v1598_v56 }
0x119c   :  { %v823_v7 = vpop.permute.xlu1 %822 }
0x119d   :  { %v825_v8 = vmul.f32 %v1206_v6, %v823_v7 }
0x119f   :  { %827 = vrot.lane.b32.xlu0 %v825_v8, %s1343_s13 }
0x1211   :  { %v828_v10 = vpop.permute.xlu0 %827 }
0x1212   :  { %v830_v11 = vadd.f32 %v828_v10, %v765_v63 }
0x1214   :  { %1207 = vtanh.f32 %v830_v11 }
0x121e   :  { %v1208_v12 = vpop.eup %1207 }
0x121f   :  { %834 = vrot.lane.b32.xlu1 %v1208_v12, %s1346_s3 }
0x1291   :  { %v835_v14 = vpop.permute.xlu1 %834 }
0x1292   :  { %v837_v17 = vmul.f32 %v835_v14, %v832_v13 }
0x1294   :  { %v839_v18 = vadd.f32 %v838_v15, %v837_v17 }
0x1296   :  { %v846_v19 = vpack.c.bf16 %v839_v18, %v839_v18 }
0x1298   :  { %848 = vrot.lane.b32.xlu0 %v846_v19, %s1346_s3 }
0x130a   :  { %v849_v20 = vpop.permute.xlu0 %848 }
0x130b   :  { %1138 = vmatmul.mubr.msk.bf16.vlgmr.msra.gmra.mrb[16].mxu1 %vm191_vm4, %v849_v20 }
0x13de   :  { %v887_v21 = vpop.f32.mrb[16].mxu1 }
0x13df   :  { %v900_v22 = vadd.f32 %v887_v21, %v1568_v3  ;;  %v1139_v23 = vpop.f32.mrb[17].mxu1  ;;  %v893_v27 = vadd.f32 %v887_v21, %v845_v26 }
0x13e0   :  { %v890_v24 = vpop.f32.mrb[18].mxu1 }
0x13e1   :  { %902 = vrot.lane.b32.xlu1 %v900_v22, %s1345_s4  ;;  %v1140_v25 = vpop.f32.mrb[19].mxu1  ;;  %v1051_v28 = vmul.f32 -1.442695, %v893_v27 }
0x13e3   :  { %1209 = vpow2.f32 %v1051_v28 }
0x13ed   :  { %v1210_v29 = vpop.eup %1209 }
0x13ee   :  { %v897_v30 = vadd.f32 1.0, %v1210_v29 }
0x13f0   :  { %1211 = vrcp.f32 %v897_v30 }
0x13fa   :  { %v1212_v31 = vpop.eup %1211 }
0x13fb   :  { %v912_v39 = vsub.f32 1.0, %v1212_v31  ;;  %v918_v41 = vmul.f32 %v1212_v31, %v839_v18 }
0x1453   :  { %v903_v32 = vpop.permute.xlu1 %902 }
0x1454   :  { %v905_v33 = vmul.f32 %v1212_v31, %v903_v32 }
0x1456   :  { %907 = vrot.lane.b32.xlu0 %v905_v33, %s1343_s13 }
0x145a   :  { %681 = vrot.lane.b32.xlu0 %v1584_v35, %s1346_s3  ;;  %v1166_v35 = vld [vmem:[%s1657_s9] sm:$0xff]  }
0x145b   :  { %1141 = vmatprep.subr.bf16.mxu0 %v1166_v35 }
0x145c   :  { %1142 = vmatpush3.bf16.msra.mxu0 %v1166_v35 }
0x145e   :  { %841 = vrot.lane.b32.xlu0 %v839_v18, %s1346_s3 }
0x14c8   :  { %v908_v3 = vpop.permute.xlu0 %907 }
0x14c9   :  { %v910_v34 = vadd.f32 %v908_v3, %v845_v26 }
0x14cb   :  { %1213 = vtanh.f32 %v910_v34 }
0x14cc   :  { %v682_v36 = vpop.permute.xlu0 %681 }
0x14cd   :  { %684 = vst.msk [vmem:[#allocation3] sm:$0xff] %vm191_vm4, %v682_v36 }
0x14d0   :  { %v842_v37 = vpop.permute.xlu0 %841 }
0x14d1   :  { %844 = vst.msk [vmem:[#allocation3 + $0x10] sm:$0xff] %vm191_vm4, %v842_v37 }
0x14d4   :  { %v925_v45 = vld [vmem:[#allocation3] sm:$0xff] }
0x14d5   :  { %v1214_v38 = vpop.eup %1213 }
0x14d6   :  { %914 = vrot.lane.b32.xlu1 %v1214_v38, %s1346_s3 }
0x14d8   :  { %v927_v49 = vld [vmem:[#allocation3 + $0x10] sm:$0xff] }
0x14da   :  { %761 = vrot.lane.b32.xlu1 %v1598_v56, %s1346_s3 }
0x1548   :  { %v915_v40 = vpop.permute.xlu1 %914 }
0x1549   :  { %v917_v42 = vmul.f32 %v915_v40, %v912_v39 }
0x154b   :  { %v919_v43 = vadd.f32 %v918_v41, %v917_v42 }
0x154c   :  { %v762_v44 = vpop.permute.xlu1 %761 }
0x154d   :  { %764 = vst.msk [vmem:[#allocation3 + $0x8] sm:$0xff] %vm191_vm4, %v762_v44  ;;  %921 = vrot.lane.b32.xlu1 %v919_v43, %s1346_s3 }
0x1554   :  { %v926_v47 = vld [vmem:[#allocation3 + $0x8] sm:$0xff] }
0x1555   :  { %v929_v16 = vpack.c.bf16 %v926_v47, %v925_v45 }
0x1557   :  { %1143 = vmatprep.mubr.msk.bf16.mxu0 %vm191_vm4, %v929_v16 }
0x15bf   :  { %v922_v48 = vpop.permute.xlu1 %921 }
0x15c0   :  { %924 = vst.msk [vmem:[#allocation3 + $0x18] sm:$0xff] %vm191_vm4, %v922_v48 }
0x15c7   :  { %v928_v50 = vld [vmem:[#allocation3 + $0x18] sm:$0xff] }
0x15c8   :  { %v930_v0 = vpack.c.bf16 %v928_v50, %v927_v49 }
0x15ca   :  { %1144 = vmatmul.mubr.msk.bf16.vlgmr.msra.gmra.mrb[20].mxu0 %vm191_vm4, %v930_v0 }
0x169d   :  { %v1145_v52 = vpop.f32.mrb[20].mxu0 }
0x169e   :  { %v995_v46 = vadd.f32 %v1145_v52, %v1052_v51  ;;  %v986_v53 = vpop.f32.mrb[21].mxu0 }
0x169f   :  { %v987_v54 = vadd.f32 %v1052_v51, %v986_v53  ;;  %v1146_v55 = vpop.f32.mrb[22].mxu0 }
0x16a0   :  { %1005 = vst [vmem:[#allocation13 + $0x10] sm:$0xff] %v995_v46  ;;  %v998_v56 = vadd.f32 %v1146_v55, %v1052_v51  ;;  %v989_v9 = vpop.f32.mrb[23].mxu0 }
0x16a1   :  { %1001 = vst [vmem:[#allocation13] sm:$0xff] %v987_v54  ;;  %v990_v57 = vadd.f32 %v1052_v51, %v989_v9 }
0x16a2   :  { %1007 = vst [vmem:[#allocation13 + $0x18] sm:$0xff] %v998_v56 }
0x16a3   :  { %1003 = vst [vmem:[#allocation13 + $0x8] sm:$0xff] %v990_v57 }
0x16a4   :  { %1314 = shalt.err (!%p1311_p8)
}
0x16a5   :  { %s1315_s27 = scalar_lea.hbm %s1659_s11, 512 }
0x16a6   :  { %p1316_p9 = scmp.ne.s32.totalorder %s1659_s11, %s1315_s27  ;;  %p1319_p10 = scmp.lt.u32.totalorder %s1315_s27, %s1659_s11 }
0x16a8   :  { %p1321_p11 = pnand %p1319_p10, %p1316_p9 }
0x16aa   :  { %1324 = shalt.err (!%p1321_p11)
}
0x16ab   :  { %1019 = dma.vmem_to_hbm [thread:$0]  %s1014_s23, 512, %s1659_s11, [#allocation7], %s1335_s1, %s1335_s1, %s1336_s18  }
0x16ac   :  { %1331 = dma.done.wait [#allocation7], 512  }
0x16ad   :  { %1332 = vsyncadd [#allocation7], 4294966784 }
0x16ae   :  { %1023 = vsyncpa [#allocation6], 1 }
0x16af   :  { %1024 = vsyncpa [#allocation9], 1 }
0x16b0   :  { %1025 = vsyncpa [#allocation12], 1 }
0x16b1   :  { %1026 = vsyncpa [#allocation7], 1 }

</bundles_post_ra>
